<compile_context>
chip_gen: v5e
topology: v5e:2x2
jax: 0.10.0
libtpu: 0.0.40
codegen_flags: <defaults>
</compile_context>

<pallas_src>
import jax
import jax.numpy as jnp
from jax.experimental import pallas as pl
from jax.experimental.pallas import tpu as pltpu


# ---------------------------------------------------------------------------
# Fused kernel: encoder LSTM -> decoder LSTM -> FC head, all VMEM resident.
# Shapes are pre-padded: Bp % 8 == 0, G = round_up(4H, 128), Vp % 128 == 0.
# ---------------------------------------------------------------------------
def seq2seq_kernel(src_ref, tgt_ref,                  # (Ts*Bp, I), (Td*Bp, D) bf16
                   wih_e_ref, whh_e_ref, be_ref,      # (I, G), (H, G) bf16; (1, G) f32
                   wih_d_ref, whh_d_ref, bd_ref,      # (D, G), (H, G) bf16; (1, G) f32
                   wfc_ref, bfc_ref,                  # (H, Vp) bf16; (1, Vp) f32
                   out_ref,                           # (L, Bp, Vp) f32, time-major
                   gxe_sc, gxd_sc, hdec_sc):          # f32 scratch
    L, Bp, Vp = out_ref.shape
    Td = L - 1
    Ts = src_ref.shape[0] // Bp
    H = whh_e_ref.shape[0]

    f32 = jnp.float32
    bf16 = jnp.bfloat16

    # ---- hoisted input projections: one large bf16 MXU matmul per LSTM -----
    gxe_sc[...] = jnp.dot(src_ref[...], wih_e_ref[...],
                          preferred_element_type=f32) + be_ref[...]
    gxd_sc[...] = jnp.dot(tgt_ref[...], wih_d_ref[...],
                          preferred_element_type=f32) + bd_ref[...]

    # Recurrent weights loaded once (not re-read inside the unrolled loops).
    whh_e = whh_e_ref[...]
    whh_d = whh_d_ref[...]

    def cell(gates, c_prev):
        # gates: (Bp, G) packed [i | f | g | o | pad]; elementwise stays f32.
        sig = jax.nn.sigmoid(gates)
        tnh = jnp.tanh(gates)
        i = sig[:, 0 * H:1 * H]
        f = sig[:, 1 * H:2 * H]
        g = tnh[:, 2 * H:3 * H]
        o = sig[:, 3 * H:4 * H]
        c = f * c_prev + i * g
        h = o * jnp.tanh(c)
        return h, c

    # ---- encoder recurrence (h/c live in vregs) -----------------------------
    h = jnp.zeros((Bp, H), f32)
    c = jnp.zeros((Bp, H), f32)
    # TODO(synk): for long sequences switch the static unrolls below to
    # lax.fori_loop carrying (h, c); unroll kept deliberately for T ~ 8.
    for t in range(Ts):
        gates = gxe_sc[pl.ds(t * Bp, Bp), :] + jnp.dot(
            h.astype(bf16), whh_e, preferred_element_type=f32)
        h, c = cell(gates, c)

    # ---- decoder recurrence (teacher forcing), record h_t -------------------
    for t in range(Td):
        gates = gxd_sc[pl.ds(t * Bp, Bp), :] + jnp.dot(
            h.astype(bf16), whh_d, preferred_element_type=f32)
        h, c = cell(gates, c)
        hdec_sc[pl.ds(t * Bp, Bp), :] = h

    # ---- hoisted FC head: one matmul over all decoder states ----------------
    logits = jnp.dot(hdec_sc[...].astype(bf16), wfc_ref[...],
                     preferred_element_type=f32) + bfc_ref[...]

    # ---- time-major output: zero only the t=0 slice, ONE dense slab store ---
    out_ref[0] = jnp.zeros((Bp, Vp), f32)
    out_ref[pl.ds(1, Td)] = logits.reshape(Td, Bp, Vp)


# ---------------------------------------------------------------------------
# Padding helpers (zero padding is exact for this LSTM + FC formulation).
# ---------------------------------------------------------------------------
def _round_up(x, m):
    return ((x + m - 1) // m) * m


# ---------------------------------------------------------------------------
# Full Model.forward:  outputs[:, 0, :] = 0; outputs[:, t, :] = decoder step t
# ---------------------------------------------------------------------------
def model_forward(source, target, params):
    B, L, D = target.shape
    _, Ts, I = source.shape
    H = params["enc_w_hh"].shape[0]
    V = params["dec_w_fc"].shape[1]
    Td = L - 1

    Bp = _round_up(B, 8)            # f32 sublane group
    G = _round_up(4 * H, 128)       # packed gate lane width [i|f|g|o|pad]
    Vp = _round_up(V, 128)          # lane-dense output stores

    f32, bf16 = jnp.float32, jnp.bfloat16

    def pad_lstm(w_ih, w_hh, b):
        # Pad only the packed-gate (last) dim; K dims (I / H) stay unpadded.
        w_ih_p = jnp.pad(w_ih, ((0, 0), (0, G - 4 * H))).astype(bf16)
        w_hh_p = jnp.pad(w_hh, ((0, 0), (0, G - 4 * H))).astype(bf16)
        b_p = jnp.pad(b, ((0, 0), (0, G - 4 * H))).astype(f32)
        return w_ih_p, w_hh_p, b_p

    wih_e, whh_e, be = pad_lstm(params["enc_w_ih"], params["enc_w_hh"],
                                params["enc_b"])
    wih_d, whh_d, bd = pad_lstm(params["dec_w_ih"], params["dec_w_hh"],
                                params["dec_b"])
    wfc = jnp.pad(params["dec_w_fc"], ((0, 0), (0, Vp - V))).astype(bf16)
    bfc = jnp.pad(params["dec_b_fc"], ((0, 0), (0, Vp - V))).astype(f32)

    # time-major, batch padded to a full sublane group, flattened to (T*Bp, F)
    src_tm = jnp.pad(jnp.transpose(source, (1, 0, 2)),
                     ((0, 0), (0, Bp - B), (0, 0))
                     ).reshape(Ts * Bp, I).astype(bf16)
    tgt_tm = jnp.pad(jnp.transpose(target[:, :Td, :], (1, 0, 2)),
                     ((0, 0), (0, Bp - B), (0, 0))
                     ).reshape(Td * Bp, D).astype(bf16)

    out_tm = pl.pallas_call(
        seq2seq_kernel,
        out_shape=jax.ShapeDtypeStruct((L, Bp, Vp), jnp.float32),
        scratch_shapes=[
            pltpu.VMEM((Ts * Bp, G), jnp.float32),   # encoder x-gates
            pltpu.VMEM((Td * Bp, G), jnp.float32),   # decoder x-gates
            pltpu.VMEM((Td * Bp, H), jnp.float32),   # decoder hidden states
        ],
        compiler_params=pltpu.CompilerParams(
            vmem_limit_bytes=48 * 1024 * 1024),
    )(src_tm, tgt_tm, wih_e, whh_e, be, wih_d, whh_d, bd, wfc, bfc)

    # batch-first view + unpad; transpose is done once by XLA so every
    # in-kernel store stays lane/sublane dense.
    return jnp.transpose(out_tm, (1, 0, 2))[:B, :, :V]


# ---------------------------------------------------------------------------
# Parameter init (weights stored transposed: x @ W; biases b_ih + b_hh folded).
# ---------------------------------------------------------------------------
def init_params(key, enc_in, dec_in, hidden, vocab):
    ks = jax.random.split(key, 8)
    s = 1.0 / jnp.sqrt(hidden)
    u = lambda k, shape: jax.random.uniform(k, shape, jnp.float32, -s, s)
    return {
        "enc_w_ih": u(ks[0], (enc_in, 4 * hidden)),
        "enc_w_hh": u(ks[1], (hidden, 4 * hidden)),
        "enc_b":    u(ks[2], (1, 4 * hidden)),
        "dec_w_ih": u(ks[3], (dec_in, 4 * hidden)),
        "dec_w_hh": u(ks[4], (hidden, 4 * hidden)),
        "dec_b":    u(ks[5], (1, 4 * hidden)),
        "dec_w_fc": u(ks[6], (hidden, vocab)),
        "dec_b_fc": u(ks[7], (1, vocab)),
    }


if __name__ == "__main__":
    B, SRC_T, TGT_T = 2, 8, 8
    ENC_IN, DEC_IN, HIDDEN, VOCAB = 16, 16, 32, 32

    key = jax.random.PRNGKey(0)
    k_src, k_tgt, k_par = jax.random.split(key, 3)
    source = jax.random.normal(k_src, (B, SRC_T, ENC_IN), jnp.float32)
    target = jax.random.normal(k_tgt, (B, TGT_T, DEC_IN), jnp.float32)
    params = init_params(k_par, ENC_IN, DEC_IN, HIDDEN, VOCAB)

    fwd = jax.jit(model_forward)
    out = fwd(source, target, params)
    jax.block_until_ready(out)
    assert out.shape == (B, TGT_T, VOCAB)
    assert bool(jnp.all(out[:, 0, :] == 0.0))
    print("KERNEL_OK")
</pallas_src>

<mosaic_0001>
module attributes {stable_mosaic.version = 11 : i64} {
  func.func @seq2seq_kernel(%arg0: memref<64x16xbf16, #tpu.memory_space<vmem>>, %arg1: memref<56x16xbf16, #tpu.memory_space<vmem>>, %arg2: memref<16x128xbf16, #tpu.memory_space<vmem>>, %arg3: memref<32x128xbf16, #tpu.memory_space<vmem>>, %arg4: memref<1x128xf32, #tpu.memory_space<vmem>>, %arg5: memref<16x128xbf16, #tpu.memory_space<vmem>>, %arg6: memref<32x128xbf16, #tpu.memory_space<vmem>>, %arg7: memref<1x128xf32, #tpu.memory_space<vmem>>, %arg8: memref<32x128xbf16, #tpu.memory_space<vmem>>, %arg9: memref<1x128xf32, #tpu.memory_space<vmem>>, %arg10: memref<8x8x128xf32, #tpu.memory_space<vmem>>, %arg11: memref<64x128xf32, #tpu.memory_space<vmem>>, %arg12: memref<56x128xf32, #tpu.memory_space<vmem>>, %arg13: memref<56x32xf32, #tpu.memory_space<vmem>>) attributes {dimension_semantics = [], scalar_prefetch = 0 : i64, scratch_operands = 3 : i64, tpu.core_type = #tpu.core_type<tc>} {
    %c0 = arith.constant 0 : index
    %c0_0 = arith.constant 0 : index
    %0 = vector.load %arg0[%c0, %c0_0] : memref<64x16xbf16, #tpu.memory_space<vmem>>, vector<64x16xbf16>
    %c0_1 = arith.constant 0 : index
    %c0_2 = arith.constant 0 : index
    %1 = vector.load %arg2[%c0_1, %c0_2] : memref<16x128xbf16, #tpu.memory_space<vmem>>, vector<16x128xbf16>
    %cst = arith.constant dense<0.000000e+00> : vector<64x128xf32>
    %2 = tpu.matmul %0, %1, %cst {dimension_numbers = #tpu.dot_dimension_numbers<[1], [0], [0], [1], [0, 0, 1, 1], [], []>} : vector<64x16xbf16>, vector<16x128xbf16>, vector<64x128xf32> -> vector<64x128xf32>
    %c0_3 = arith.constant 0 : index
    %c0_4 = arith.constant 0 : index
    %3 = vector.load %arg4[%c0_3, %c0_4] : memref<1x128xf32, #tpu.memory_space<vmem>>, vector<1x128xf32>
    %4 = vector.broadcast %3 : vector<1x128xf32> to vector<64x128xf32>
    %5 = arith.addf %2, %4 : vector<64x128xf32>
    %c0_5 = arith.constant 0 : index
    %c0_6 = arith.constant 0 : index
    %6 = vector.load %arg11[%c0_5, %c0_6] : memref<64x128xf32, #tpu.memory_space<vmem>>, vector<64x128xf32>
    tpu.vector_store %arg11[%c0_5, %c0_6], %5 {strides = array<i32>} : memref<64x128xf32, #tpu.memory_space<vmem>>, vector<64x128xf32>,
    %c0_7 = arith.constant 0 : index
    %c0_8 = arith.constant 0 : index
    %7 = vector.load %arg1[%c0_7, %c0_8] : memref<56x16xbf16, #tpu.memory_space<vmem>>, vector<56x16xbf16>
    %c0_9 = arith.constant 0 : index
    %c0_10 = arith.constant 0 : index
    %8 = vector.load %arg5[%c0_9, %c0_10] : memref<16x128xbf16, #tpu.memory_space<vmem>>, vector<16x128xbf16>
    %cst_11 = arith.constant dense<0.000000e+00> : vector<56x128xf32>
    %9 = tpu.matmul %7, %8, %cst_11 {dimension_numbers = #tpu.dot_dimension_numbers<[1], [0], [0], [1], [0, 0, 1, 1], [], []>} : vector<56x16xbf16>, vector<16x128xbf16>, vector<56x128xf32> -> vector<56x128xf32>
    %c0_12 = arith.constant 0 : index
    %c0_13 = arith.constant 0 : index
    %10 = vector.load %arg7[%c0_12, %c0_13] : memref<1x128xf32, #tpu.memory_space<vmem>>, vector<1x128xf32>
    %11 = vector.broadcast %10 : vector<1x128xf32> to vector<56x128xf32>
    %12 = arith.addf %9, %11 : vector<56x128xf32>
    %c0_14 = arith.constant 0 : index
    %c0_15 = arith.constant 0 : index
    %13 = vector.load %arg12[%c0_14, %c0_15] : memref<56x128xf32, #tpu.memory_space<vmem>>, vector<56x128xf32>
    tpu.vector_store %arg12[%c0_14, %c0_15], %12 {strides = array<i32>} : memref<56x128xf32, #tpu.memory_space<vmem>>, vector<56x128xf32>,
    %c0_16 = arith.constant 0 : index
    %c0_17 = arith.constant 0 : index
    %14 = vector.load %arg3[%c0_16, %c0_17] : memref<32x128xbf16, #tpu.memory_space<vmem>>, vector<32x128xbf16>
    %c0_18 = arith.constant 0 : index
    %c0_19 = arith.constant 0 : index
    %15 = vector.load %arg6[%c0_18, %c0_19] : memref<32x128xbf16, #tpu.memory_space<vmem>>, vector<32x128xbf16>
    %cst_20 = arith.constant 0.000000e+00 : f32
    %16 = vector.broadcast %cst_20 : f32 to vector<8x32xf32>
    %cst_21 = arith.constant 0.000000e+00 : f32
    %17 = vector.broadcast %cst_21 : f32 to vector<8x32xf32>
    %c0_22 = arith.constant 0 : index
    %c0_23 = arith.constant 0 : index
    %18 = vector.load %arg11[%c0_22, %c0_23] : memref<64x128xf32, #tpu.memory_space<vmem>>, vector<8x128xf32>
    %19 = arith.truncf %16 : vector<8x32xf32> to vector<8x32xbf16>
    %cst_24 = arith.constant dense<0.000000e+00> : vector<8x128xf32>
    %20 = tpu.matmul %19, %14, %cst_24 {dimension_numbers = #tpu.dot_dimension_numbers<[1], [0], [0], [1], [0, 0, 1, 1], [], []>} : vector<8x32xbf16>, vector<32x128xbf16>, vector<8x128xf32> -> vector<8x128xf32>
    %21 = arith.addf %18, %20 : vector<8x128xf32>
    %22 = arith.negf %21 : vector<8x128xf32>
    %23 = math.exp %22 : vector<8x128xf32>
    %cst_25 = arith.constant 1.000000e+00 : f32
    %24 = vector.broadcast %cst_25 : f32 to vector<8x128xf32>
    %25 = arith.addf %24, %23 : vector<8x128xf32>
    %26 = arith.divf %24, %25 : vector<8x128xf32>
    %27 = math.tanh %21 : vector<8x128xf32>
    %28 = vector.extract_strided_slice %26 {offsets = [0, 0], sizes = [8, 32], strides = [1, 1]} : vector<8x128xf32> to vector<8x32xf32>
    %29 = vector.extract_strided_slice %26 {offsets = [0, 32], sizes = [8, 32], strides = [1, 1]} : vector<8x128xf32> to vector<8x32xf32>
    %30 = vector.extract_strided_slice %27 {offsets = [0, 64], sizes = [8, 32], strides = [1, 1]} : vector<8x128xf32> to vector<8x32xf32>
    %31 = vector.extract_strided_slice %26 {offsets = [0, 96], sizes = [8, 32], strides = [1, 1]} : vector<8x128xf32> to vector<8x32xf32>
    %32 = arith.mulf %29, %17 : vector<8x32xf32>
    %33 = arith.mulf %28, %30 : vector<8x32xf32>
    %34 = arith.addf %32, %33 : vector<8x32xf32>
    %35 = math.tanh %34 : vector<8x32xf32>
    %36 = arith.mulf %31, %35 : vector<8x32xf32>
    %c8 = arith.constant 8 : index
    %c0_26 = arith.constant 0 : index
    %37 = vector.load %arg11[%c8, %c0_26] : memref<64x128xf32, #tpu.memory_space<vmem>>, vector<8x128xf32>
    %38 = arith.truncf %36 : vector<8x32xf32> to vector<8x32xbf16>
    %cst_27 = arith.constant dense<0.000000e+00> : vector<8x128xf32>
    %39 = tpu.matmul %38, %14, %cst_27 {dimension_numbers = #tpu.dot_dimension_numbers<[1], [0], [0], [1], [0, 0, 1, 1], [], []>} : vector<8x32xbf16>, vector<32x128xbf16>, vector<8x128xf32> -> vector<8x128xf32>
    %40 = arith.addf %37, %39 : vector<8x128xf32>
    %41 = arith.negf %40 : vector<8x128xf32>
    %42 = math.exp %41 : vector<8x128xf32>
    %cst_28 = arith.constant 1.000000e+00 : f32
    %43 = vector.broadcast %cst_28 : f32 to vector<8x128xf32>
    %44 = arith.addf %43, %42 : vector<8x128xf32>
    %45 = arith.divf %43, %44 : vector<8x128xf32>
    %46 = math.tanh %40 : vector<8x128xf32>
    %47 = vector.extract_strided_slice %45 {offsets = [0, 0], sizes = [8, 32], strides = [1, 1]} : vector<8x128xf32> to vector<8x32xf32>
    %48 = vector.extract_strided_slice %45 {offsets = [0, 32], sizes = [8, 32], strides = [1, 1]} : vector<8x128xf32> to vector<8x32xf32>
    %49 = vector.extract_strided_slice %46 {offsets = [0, 64], sizes = [8, 32], strides = [1, 1]} : vector<8x128xf32> to vector<8x32xf32>
    %50 = vector.extract_strided_slice %45 {offsets = [0, 96], sizes = [8, 32], strides = [1, 1]} : vector<8x128xf32> to vector<8x32xf32>
    %51 = arith.mulf %48, %34 : vector<8x32xf32>
    %52 = arith.mulf %47, %49 : vector<8x32xf32>
    %53 = arith.addf %51, %52 : vector<8x32xf32>
    %54 = math.tanh %53 : vector<8x32xf32>
    %55 = arith.mulf %50, %54 : vector<8x32xf32>
    %c16 = arith.constant 16 : index
    %c0_29 = arith.constant 0 : index
    %56 = vector.load %arg11[%c16, %c0_29] : memref<64x128xf32, #tpu.memory_space<vmem>>, vector<8x128xf32>
    %57 = arith.truncf %55 : vector<8x32xf32> to vector<8x32xbf16>
    %cst_30 = arith.constant dense<0.000000e+00> : vector<8x128xf32>
    %58 = tpu.matmul %57, %14, %cst_30 {dimension_numbers = #tpu.dot_dimension_numbers<[1], [0], [0], [1], [0, 0, 1, 1], [], []>} : vector<8x32xbf16>, vector<32x128xbf16>, vector<8x128xf32> -> vector<8x128xf32>
    %59 = arith.addf %56, %58 : vector<8x128xf32>
    %60 = arith.negf %59 : vector<8x128xf32>
    %61 = math.exp %60 : vector<8x128xf32>
    %cst_31 = arith.constant 1.000000e+00 : f32
    %62 = vector.broadcast %cst_31 : f32 to vector<8x128xf32>
    %63 = arith.addf %62, %61 : vector<8x128xf32>
    %64 = arith.divf %62, %63 : vector<8x128xf32>
    %65 = math.tanh %59 : vector<8x128xf32>
    %66 = vector.extract_strided_slice %64 {offsets = [0, 0], sizes = [8, 32], strides = [1, 1]} : vector<8x128xf32> to vector<8x32xf32>
    %67 = vector.extract_strided_slice %64 {offsets = [0, 32], sizes = [8, 32], strides = [1, 1]} : vector<8x128xf32> to vector<8x32xf32>
    %68 = vector.extract_strided_slice %65 {offsets = [0, 64], sizes = [8, 32], strides = [1, 1]} : vector<8x128xf32> to vector<8x32xf32>
    %69 = vector.extract_strided_slice %64 {offsets = [0, 96], sizes = [8, 32], strides = [1, 1]} : vector<8x128xf32> to vector<8x32xf32>
    %70 = arith.mulf %67, %53 : vector<8x32xf32>
    %71 = arith.mulf %66, %68 : vector<8x32xf32>
    %72 = arith.addf %70, %71 : vector<8x32xf32>
    %73 = math.tanh %72 : vector<8x32xf32>
    %74 = arith.mulf %69, %73 : vector<8x32xf32>
    %c24 = arith.constant 24 : index
    %c0_32 = arith.constant 0 : index
    %75 = vector.load %arg11[%c24, %c0_32] : memref<64x128xf32, #tpu.memory_space<vmem>>, vector<8x128xf32>
    %76 = arith.truncf %74 : vector<8x32xf32> to vector<8x32xbf16>
    %cst_33 = arith.constant dense<0.000000e+00> : vector<8x128xf32>
    %77 = tpu.matmul %76, %14, %cst_33 {dimension_numbers = #tpu.dot_dimension_numbers<[1], [0], [0], [1], [0, 0, 1, 1], [], []>} : vector<8x32xbf16>, vector<32x128xbf16>, vector<8x128xf32> -> vector<8x128xf32>
    %78 = arith.addf %75, %77 : vector<8x128xf32>
    %79 = arith.negf %78 : vector<8x128xf32>
    %80 = math.exp %79 : vector<8x128xf32>
    %cst_34 = arith.constant 1.000000e+00 : f32
    %81 = vector.broadcast %cst_34 : f32 to vector<8x128xf32>
    %82 = arith.addf %81, %80 : vector<8x128xf32>
    %83 = arith.divf %81, %82 : vector<8x128xf32>
    %84 = math.tanh %78 : vector<8x128xf32>
    %85 = vector.extract_strided_slice %83 {offsets = [0, 0], sizes = [8, 32], strides = [1, 1]} : vector<8x128xf32> to vector<8x32xf32>
    %86 = vector.extract_strided_slice %83 {offsets = [0, 32], sizes = [8, 32], strides = [1, 1]} : vector<8x128xf32> to vector<8x32xf32>
    %87 = vector.extract_strided_slice %84 {offsets = [0, 64], sizes = [8, 32], strides = [1, 1]} : vector<8x128xf32> to vector<8x32xf32>
    %88 = vector.extract_strided_slice %83 {offsets = [0, 96], sizes = [8, 32], strides = [1, 1]} : vector<8x128xf32> to vector<8x32xf32>
    %89 = arith.mulf %86, %72 : vector<8x32xf32>
    %90 = arith.mulf %85, %87 : vector<8x32xf32>
    %91 = arith.addf %89, %90 : vector<8x32xf32>
    %92 = math.tanh %91 : vector<8x32xf32>
    %93 = arith.mulf %88, %92 : vector<8x32xf32>
    %c32 = arith.constant 32 : index
    %c0_35 = arith.constant 0 : index
    %94 = vector.load %arg11[%c32, %c0_35] : memref<64x128xf32, #tpu.memory_space<vmem>>, vector<8x128xf32>
    %95 = arith.truncf %93 : vector<8x32xf32> to vector<8x32xbf16>
    %cst_36 = arith.constant dense<0.000000e+00> : vector<8x128xf32>
    %96 = tpu.matmul %95, %14, %cst_36 {dimension_numbers = #tpu.dot_dimension_numbers<[1], [0], [0], [1], [0, 0, 1, 1], [], []>} : vector<8x32xbf16>, vector<32x128xbf16>, vector<8x128xf32> -> vector<8x128xf32>
    %97 = arith.addf %94, %96 : vector<8x128xf32>
    %98 = arith.negf %97 : vector<8x128xf32>
    %99 = math.exp %98 : vector<8x128xf32>
    %cst_37 = arith.constant 1.000000e+00 : f32
    %100 = vector.broadcast %cst_37 : f32 to vector<8x128xf32>
    %101 = arith.addf %100, %99 : vector<8x128xf32>
    %102 = arith.divf %100, %101 : vector<8x128xf32>
    %103 = math.tanh %97 : vector<8x128xf32>
    %104 = vector.extract_strided_slice %102 {offsets = [0, 0], sizes = [8, 32], strides = [1, 1]} : vector<8x128xf32> to vector<8x32xf32>
    %105 = vector.extract_strided_slice %102 {offsets = [0, 32], sizes = [8, 32], strides = [1, 1]} : vector<8x128xf32> to vector<8x32xf32>
    %106 = vector.extract_strided_slice %103 {offsets = [0, 64], sizes = [8, 32], strides = [1, 1]} : vector<8x128xf32> to vector<8x32xf32>
    %107 = vector.extract_strided_slice %102 {offsets = [0, 96], sizes = [8, 32], strides = [1, 1]} : vector<8x128xf32> to vector<8x32xf32>
    %108 = arith.mulf %105, %91 : vector<8x32xf32>
    %109 = arith.mulf %104, %106 : vector<8x32xf32>
    %110 = arith.addf %108, %109 : vector<8x32xf32>
    %111 = math.tanh %110 : vector<8x32xf32>
    %112 = arith.mulf %107, %111 : vector<8x32xf32>
    %c40 = arith.constant 40 : index
    %c0_38 = arith.constant 0 : index
    %113 = vector.load %arg11[%c40, %c0_38] : memref<64x128xf32, #tpu.memory_space<vmem>>, vector<8x128xf32>
    %114 = arith.truncf %112 : vector<8x32xf32> to vector<8x32xbf16>
    %cst_39 = arith.constant dense<0.000000e+00> : vector<8x128xf32>
    %115 = tpu.matmul %114, %14, %cst_39 {dimension_numbers = #tpu.dot_dimension_numbers<[1], [0], [0], [1], [0, 0, 1, 1], [], []>} : vector<8x32xbf16>, vector<32x128xbf16>, vector<8x128xf32> -> vector<8x128xf32>
    %116 = arith.addf %113, %115 : vector<8x128xf32>
    %117 = arith.negf %116 : vector<8x128xf32>
    %118 = math.exp %117 : vector<8x128xf32>
    %cst_40 = arith.constant 1.000000e+00 : f32
    %119 = vector.broadcast %cst_40 : f32 to vector<8x128xf32>
    %120 = arith.addf %119, %118 : vector<8x128xf32>
    %121 = arith.divf %119, %120 : vector<8x128xf32>
    %122 = math.tanh %116 : vector<8x128xf32>
    %123 = vector.extract_strided_slice %121 {offsets = [0, 0], sizes = [8, 32], strides = [1, 1]} : vector<8x128xf32> to vector<8x32xf32>
    %124 = vector.extract_strided_slice %121 {offsets = [0, 32], sizes = [8, 32], strides = [1, 1]} : vector<8x128xf32> to vector<8x32xf32>
    %125 = vector.extract_strided_slice %122 {offsets = [0, 64], sizes = [8, 32], strides = [1, 1]} : vector<8x128xf32> to vector<8x32xf32>
    %126 = vector.extract_strided_slice %121 {offsets = [0, 96], sizes = [8, 32], strides = [1, 1]} : vector<8x128xf32> to vector<8x32xf32>
    %127 = arith.mulf %124, %110 : vector<8x32xf32>
    %128 = arith.mulf %123, %125 : vector<8x32xf32>
    %129 = arith.addf %127, %128 : vector<8x32xf32>
    %130 = math.tanh %129 : vector<8x32xf32>
    %131 = arith.mulf %126, %130 : vector<8x32xf32>
    %c48 = arith.constant 48 : index
    %c0_41 = arith.constant 0 : index
    %132 = vector.load %arg11[%c48, %c0_41] : memref<64x128xf32, #tpu.memory_space<vmem>>, vector<8x128xf32>
    %133 = arith.truncf %131 : vector<8x32xf32> to vector<8x32xbf16>
    %cst_42 = arith.constant dense<0.000000e+00> : vector<8x128xf32>
    %134 = tpu.matmul %133, %14, %cst_42 {dimension_numbers = #tpu.dot_dimension_numbers<[1], [0], [0], [1], [0, 0, 1, 1], [], []>} : vector<8x32xbf16>, vector<32x128xbf16>, vector<8x128xf32> -> vector<8x128xf32>
    %135 = arith.addf %132, %134 : vector<8x128xf32>
    %136 = arith.negf %135 : vector<8x128xf32>
    %137 = math.exp %136 : vector<8x128xf32>
    %cst_43 = arith.constant 1.000000e+00 : f32
    %138 = vector.broadcast %cst_43 : f32 to vector<8x128xf32>
    %139 = arith.addf %138, %137 : vector<8x128xf32>
    %140 = arith.divf %138, %139 : vector<8x128xf32>
    %141 = math.tanh %135 : vector<8x128xf32>
    %142 = vector.extract_strided_slice %140 {offsets = [0, 0], sizes = [8, 32], strides = [1, 1]} : vector<8x128xf32> to vector<8x32xf32>
    %143 = vector.extract_strided_slice %140 {offsets = [0, 32], sizes = [8, 32], strides = [1, 1]} : vector<8x128xf32> to vector<8x32xf32>
    %144 = vector.extract_strided_slice %141 {offsets = [0, 64], sizes = [8, 32], strides = [1, 1]} : vector<8x128xf32> to vector<8x32xf32>
    %145 = vector.extract_strided_slice %140 {offsets = [0, 96], sizes = [8, 32], strides = [1, 1]} : vector<8x128xf32> to vector<8x32xf32>
    %146 = arith.mulf %143, %129 : vector<8x32xf32>
    %147 = arith.mulf %142, %144 : vector<8x32xf32>
    %148 = arith.addf %146, %147 : vector<8x32xf32>
    %149 = math.tanh %148 : vector<8x32xf32>
    %150 = arith.mulf %145, %149 : vector<8x32xf32>
    %c56 = arith.constant 56 : index
    %c0_44 = arith.constant 0 : index
    %151 = vector.load %arg11[%c56, %c0_44] : memref<64x128xf32, #tpu.memory_space<vmem>>, vector<8x128xf32>
    %152 = arith.truncf %150 : vector<8x32xf32> to vector<8x32xbf16>
    %cst_45 = arith.constant dense<0.000000e+00> : vector<8x128xf32>
    %153 = tpu.matmul %152, %14, %cst_45 {dimension_numbers = #tpu.dot_dimension_numbers<[1], [0], [0], [1], [0, 0, 1, 1], [], []>} : vector<8x32xbf16>, vector<32x128xbf16>, vector<8x128xf32> -> vector<8x128xf32>
    %154 = arith.addf %151, %153 : vector<8x128xf32>
    %155 = arith.negf %154 : vector<8x128xf32>
    %156 = math.exp %155 : vector<8x128xf32>
    %cst_46 = arith.constant 1.000000e+00 : f32
    %157 = vector.broadcast %cst_46 : f32 to vector<8x128xf32>
    %158 = arith.addf %157, %156 : vector<8x128xf32>
    %159 = arith.divf %157, %158 : vector<8x128xf32>
    %160 = math.tanh %154 : vector<8x128xf32>
    %161 = vector.extract_strided_slice %159 {offsets = [0, 0], sizes = [8, 32], strides = [1, 1]} : vector<8x128xf32> to vector<8x32xf32>
    %162 = vector.extract_strided_slice %159 {offsets = [0, 32], sizes = [8, 32], strides = [1, 1]} : vector<8x128xf32> to vector<8x32xf32>
    %163 = vector.extract_strided_slice %160 {offsets = [0, 64], sizes = [8, 32], strides = [1, 1]} : vector<8x128xf32> to vector<8x32xf32>
    %164 = vector.extract_strided_slice %159 {offsets = [0, 96], sizes = [8, 32], strides = [1, 1]} : vector<8x128xf32> to vector<8x32xf32>
    %165 = arith.mulf %162, %148 : vector<8x32xf32>
    %166 = arith.mulf %161, %163 : vector<8x32xf32>
    %167 = arith.addf %165, %166 : vector<8x32xf32>
    %168 = math.tanh %167 : vector<8x32xf32>
    %169 = arith.mulf %164, %168 : vector<8x32xf32>
    %c0_47 = arith.constant 0 : index
    %c0_48 = arith.constant 0 : index
    %170 = vector.load %arg12[%c0_47, %c0_48] : memref<56x128xf32, #tpu.memory_space<vmem>>, vector<8x128xf32>
    %171 = arith.truncf %169 : vector<8x32xf32> to vector<8x32xbf16>
    %cst_49 = arith.constant dense<0.000000e+00> : vector<8x128xf32>
    %172 = tpu.matmul %171, %15, %cst_49 {dimension_numbers = #tpu.dot_dimension_numbers<[1], [0], [0], [1], [0, 0, 1, 1], [], []>} : vector<8x32xbf16>, vector<32x128xbf16>, vector<8x128xf32> -> vector<8x128xf32>
    %173 = arith.addf %170, %172 : vector<8x128xf32>
    %174 = arith.negf %173 : vector<8x128xf32>
    %175 = math.exp %174 : vector<8x128xf32>
    %cst_50 = arith.constant 1.000000e+00 : f32
    %176 = vector.broadcast %cst_50 : f32 to vector<8x128xf32>
    %177 = arith.addf %176, %175 : vector<8x128xf32>
    %178 = arith.divf %176, %177 : vector<8x128xf32>
    %179 = math.tanh %173 : vector<8x128xf32>
    %180 = vector.extract_strided_slice %178 {offsets = [0, 0], sizes = [8, 32], strides = [1, 1]} : vector<8x128xf32> to vector<8x32xf32>
    %181 = vector.extract_strided_slice %178 {offsets = [0, 32], sizes = [8, 32], strides = [1, 1]} : vector<8x128xf32> to vector<8x32xf32>
    %182 = vector.extract_strided_slice %179 {offsets = [0, 64], sizes = [8, 32], strides = [1, 1]} : vector<8x128xf32> to vector<8x32xf32>
    %183 = vector.extract_strided_slice %178 {offsets = [0, 96], sizes = [8, 32], strides = [1, 1]} : vector<8x128xf32> to vector<8x32xf32>
    %184 = arith.mulf %181, %167 : vector<8x32xf32>
    %185 = arith.mulf %180, %182 : vector<8x32xf32>
    %186 = arith.addf %184, %185 : vector<8x32xf32>
    %187 = math.tanh %186 : vector<8x32xf32>
    %188 = arith.mulf %183, %187 : vector<8x32xf32>
    %c0_51 = arith.constant 0 : index
    %c0_52 = arith.constant 0 : index
    %189 = vector.load %arg13[%c0_51, %c0_52] : memref<56x32xf32, #tpu.memory_space<vmem>>, vector<8x32xf32>
    tpu.vector_store %arg13[%c0_51, %c0_52], %188 {strides = array<i32>} : memref<56x32xf32, #tpu.memory_space<vmem>>, vector<8x32xf32>,
    %c8_53 = arith.constant 8 : index
    %c0_54 = arith.constant 0 : index
    %190 = vector.load %arg12[%c8_53, %c0_54] : memref<56x128xf32, #tpu.memory_space<vmem>>, vector<8x128xf32>
    %191 = arith.truncf %188 : vector<8x32xf32> to vector<8x32xbf16>
    %cst_55 = arith.constant dense<0.000000e+00> : vector<8x128xf32>
    %192 = tpu.matmul %191, %15, %cst_55 {dimension_numbers = #tpu.dot_dimension_numbers<[1], [0], [0], [1], [0, 0, 1, 1], [], []>} : vector<8x32xbf16>, vector<32x128xbf16>, vector<8x128xf32> -> vector<8x128xf32>
    %193 = arith.addf %190, %192 : vector<8x128xf32>
    %194 = arith.negf %193 : vector<8x128xf32>
    %195 = math.exp %194 : vector<8x128xf32>
    %cst_56 = arith.constant 1.000000e+00 : f32
    %196 = vector.broadcast %cst_56 : f32 to vector<8x128xf32>
    %197 = arith.addf %196, %195 : vector<8x128xf32>
    %198 = arith.divf %196, %197 : vector<8x128xf32>
    %199 = math.tanh %193 : vector<8x128xf32>
    %200 = vector.extract_strided_slice %198 {offsets = [0, 0], sizes = [8, 32], strides = [1, 1]} : vector<8x128xf32> to vector<8x32xf32>
    %201 = vector.extract_strided_slice %198 {offsets = [0, 32], sizes = [8, 32], strides = [1, 1]} : vector<8x128xf32> to vector<8x32xf32>
    %202 = vector.extract_strided_slice %199 {offsets = [0, 64], sizes = [8, 32], strides = [1, 1]} : vector<8x128xf32> to vector<8x32xf32>
    %203 = vector.extract_strided_slice %198 {offsets = [0, 96], sizes = [8, 32], strides = [1, 1]} : vector<8x128xf32> to vector<8x32xf32>
    %204 = arith.mulf %201, %186 : vector<8x32xf32>
    %205 = arith.mulf %200, %202 : vector<8x32xf32>
    %206 = arith.addf %204, %205 : vector<8x32xf32>
    %207 = math.tanh %206 : vector<8x32xf32>
    %208 = arith.mulf %203, %207 : vector<8x32xf32>
    %c8_57 = arith.constant 8 : index
    %c0_58 = arith.constant 0 : index
    %209 = vector.load %arg13[%c8_57, %c0_58] : memref<56x32xf32, #tpu.memory_space<vmem>>, vector<8x32xf32>
    tpu.vector_store %arg13[%c8_57, %c0_58], %208 {strides = array<i32>} : memref<56x32xf32, #tpu.memory_space<vmem>>, vector<8x32xf32>,
    %c16_59 = arith.constant 16 : index
    %c0_60 = arith.constant 0 : index
    %210 = vector.load %arg12[%c16_59, %c0_60] : memref<56x128xf32, #tpu.memory_space<vmem>>, vector<8x128xf32>
    %211 = arith.truncf %208 : vector<8x32xf32> to vector<8x32xbf16>
    %cst_61 = arith.constant dense<0.000000e+00> : vector<8x128xf32>
    %212 = tpu.matmul %211, %15, %cst_61 {dimension_numbers = #tpu.dot_dimension_numbers<[1], [0], [0], [1], [0, 0, 1, 1], [], []>} : vector<8x32xbf16>, vector<32x128xbf16>, vector<8x128xf32> -> vector<8x128xf32>
    %213 = arith.addf %210, %212 : vector<8x128xf32>
    %214 = arith.negf %213 : vector<8x128xf32>
    %215 = math.exp %214 : vector<8x128xf32>
    %cst_62 = arith.constant 1.000000e+00 : f32
    %216 = vector.broadcast %cst_62 : f32 to vector<8x128xf32>
    %217 = arith.addf %216, %215 : vector<8x128xf32>
    %218 = arith.divf %216, %217 : vector<8x128xf32>
    %219 = math.tanh %213 : vector<8x128xf32>
    %220 = vector.extract_strided_slice %218 {offsets = [0, 0], sizes = [8, 32], strides = [1, 1]} : vector<8x128xf32> to vector<8x32xf32>
    %221 = vector.extract_strided_slice %218 {offsets = [0, 32], sizes = [8, 32], strides = [1, 1]} : vector<8x128xf32> to vector<8x32xf32>
    %222 = vector.extract_strided_slice %219 {offsets = [0, 64], sizes = [8, 32], strides = [1, 1]} : vector<8x128xf32> to vector<8x32xf32>
    %223 = vector.extract_strided_slice %218 {offsets = [0, 96], sizes = [8, 32], strides = [1, 1]} : vector<8x128xf32> to vector<8x32xf32>
    %224 = arith.mulf %221, %206 : vector<8x32xf32>
    %225 = arith.mulf %220, %222 : vector<8x32xf32>
    %226 = arith.addf %224, %225 : vector<8x32xf32>
    %227 = math.tanh %226 : vector<8x32xf32>
    %228 = arith.mulf %223, %227 : vector<8x32xf32>
    %c16_63 = arith.constant 16 : index
    %c0_64 = arith.constant 0 : index
    %229 = vector.load %arg13[%c16_63, %c0_64] : memref<56x32xf32, #tpu.memory_space<vmem>>, vector<8x32xf32>
    tpu.vector_store %arg13[%c16_63, %c0_64], %228 {strides = array<i32>} : memref<56x32xf32, #tpu.memory_space<vmem>>, vector<8x32xf32>,
    %c24_65 = arith.constant 24 : index
    %c0_66 = arith.constant 0 : index
    %230 = vector.load %arg12[%c24_65, %c0_66] : memref<56x128xf32, #tpu.memory_space<vmem>>, vector<8x128xf32>
    %231 = arith.truncf %228 : vector<8x32xf32> to vector<8x32xbf16>
    %cst_67 = arith.constant dense<0.000000e+00> : vector<8x128xf32>
    %232 = tpu.matmul %231, %15, %cst_67 {dimension_numbers = #tpu.dot_dimension_numbers<[1], [0], [0], [1], [0, 0, 1, 1], [], []>} : vector<8x32xbf16>, vector<32x128xbf16>, vector<8x128xf32> -> vector<8x128xf32>
    %233 = arith.addf %230, %232 : vector<8x128xf32>
    %234 = arith.negf %233 : vector<8x128xf32>
    %235 = math.exp %234 : vector<8x128xf32>
    %cst_68 = arith.constant 1.000000e+00 : f32
    %236 = vector.broadcast %cst_68 : f32 to vector<8x128xf32>
    %237 = arith.addf %236, %235 : vector<8x128xf32>
    %238 = arith.divf %236, %237 : vector<8x128xf32>
    %239 = math.tanh %233 : vector<8x128xf32>
    %240 = vector.extract_strided_slice %238 {offsets = [0, 0], sizes = [8, 32], strides = [1, 1]} : vector<8x128xf32> to vector<8x32xf32>
    %241 = vector.extract_strided_slice %238 {offsets = [0, 32], sizes = [8, 32], strides = [1, 1]} : vector<8x128xf32> to vector<8x32xf32>
    %242 = vector.extract_strided_slice %239 {offsets = [0, 64], sizes = [8, 32], strides = [1, 1]} : vector<8x128xf32> to vector<8x32xf32>
    %243 = vector.extract_strided_slice %238 {offsets = [0, 96], sizes = [8, 32], strides = [1, 1]} : vector<8x128xf32> to vector<8x32xf32>
    %244 = arith.mulf %241, %226 : vector<8x32xf32>
    %245 = arith.mulf %240, %242 : vector<8x32xf32>
    %246 = arith.addf %244, %245 : vector<8x32xf32>
    %247 = math.tanh %246 : vector<8x32xf32>
    %248 = arith.mulf %243, %247 : vector<8x32xf32>
    %c24_69 = arith.constant 24 : index
    %c0_70 = arith.constant 0 : index
    %249 = vector.load %arg13[%c24_69, %c0_70] : memref<56x32xf32, #tpu.memory_space<vmem>>, vector<8x32xf32>
    tpu.vector_store %arg13[%c24_69, %c0_70], %248 {strides = array<i32>} : memref<56x32xf32, #tpu.memory_space<vmem>>, vector<8x32xf32>,
    %c32_71 = arith.constant 32 : index
    %c0_72 = arith.constant 0 : index
    %250 = vector.load %arg12[%c32_71, %c0_72] : memref<56x128xf32, #tpu.memory_space<vmem>>, vector<8x128xf32>
    %251 = arith.truncf %248 : vector<8x32xf32> to vector<8x32xbf16>
    %cst_73 = arith.constant dense<0.000000e+00> : vector<8x128xf32>
    %252 = tpu.matmul %251, %15, %cst_73 {dimension_numbers = #tpu.dot_dimension_numbers<[1], [0], [0], [1], [0, 0, 1, 1], [], []>} : vector<8x32xbf16>, vector<32x128xbf16>, vector<8x128xf32> -> vector<8x128xf32>
    %253 = arith.addf %250, %252 : vector<8x128xf32>
    %254 = arith.negf %253 : vector<8x128xf32>
    %255 = math.exp %254 : vector<8x128xf32>
    %cst_74 = arith.constant 1.000000e+00 : f32
    %256 = vector.broadcast %cst_74 : f32 to vector<8x128xf32>
    %257 = arith.addf %256, %255 : vector<8x128xf32>
    %258 = arith.divf %256, %257 : vector<8x128xf32>
    %259 = math.tanh %253 : vector<8x128xf32>
    %260 = vector.extract_strided_slice %258 {offsets = [0, 0], sizes = [8, 32], strides = [1, 1]} : vector<8x128xf32> to vector<8x32xf32>
    %261 = vector.extract_strided_slice %258 {offsets = [0, 32], sizes = [8, 32], strides = [1, 1]} : vector<8x128xf32> to vector<8x32xf32>
    %262 = vector.extract_strided_slice %259 {offsets = [0, 64], sizes = [8, 32], strides = [1, 1]} : vector<8x128xf32> to vector<8x32xf32>
    %263 = vector.extract_strided_slice %258 {offsets = [0, 96], sizes = [8, 32], strides = [1, 1]} : vector<8x128xf32> to vector<8x32xf32>
    %264 = arith.mulf %261, %246 : vector<8x32xf32>
    %265 = arith.mulf %260, %262 : vector<8x32xf32>
    %266 = arith.addf %264, %265 : vector<8x32xf32>
    %267 = math.tanh %266 : vector<8x32xf32>
    %268 = arith.mulf %263, %267 : vector<8x32xf32>
    %c32_75 = arith.constant 32 : index
    %c0_76 = arith.constant 0 : index
    %269 = vector.load %arg13[%c32_75, %c0_76] : memref<56x32xf32, #tpu.memory_space<vmem>>, vector<8x32xf32>
    tpu.vector_store %arg13[%c32_75, %c0_76], %268 {strides = array<i32>} : memref<56x32xf32, #tpu.memory_space<vmem>>, vector<8x32xf32>,
    %c40_77 = arith.constant 40 : index
    %c0_78 = arith.constant 0 : index
    %270 = vector.load %arg12[%c40_77, %c0_78] : memref<56x128xf32, #tpu.memory_space<vmem>>, vector<8x128xf32>
    %271 = arith.truncf %268 : vector<8x32xf32> to vector<8x32xbf16>
    %cst_79 = arith.constant dense<0.000000e+00> : vector<8x128xf32>
    %272 = tpu.matmul %271, %15, %cst_79 {dimension_numbers = #tpu.dot_dimension_numbers<[1], [0], [0], [1], [0, 0, 1, 1], [], []>} : vector<8x32xbf16>, vector<32x128xbf16>, vector<8x128xf32> -> vector<8x128xf32>
    %273 = arith.addf %270, %272 : vector<8x128xf32>
    %274 = arith.negf %273 : vector<8x128xf32>
    %275 = math.exp %274 : vector<8x128xf32>
    %cst_80 = arith.constant 1.000000e+00 : f32
    %276 = vector.broadcast %cst_80 : f32 to vector<8x128xf32>
    %277 = arith.addf %276, %275 : vector<8x128xf32>
    %278 = arith.divf %276, %277 : vector<8x128xf32>
    %279 = math.tanh %273 : vector<8x128xf32>
    %280 = vector.extract_strided_slice %278 {offsets = [0, 0], sizes = [8, 32], strides = [1, 1]} : vector<8x128xf32> to vector<8x32xf32>
    %281 = vector.extract_strided_slice %278 {offsets = [0, 32], sizes = [8, 32], strides = [1, 1]} : vector<8x128xf32> to vector<8x32xf32>
    %282 = vector.extract_strided_slice %279 {offsets = [0, 64], sizes = [8, 32], strides = [1, 1]} : vector<8x128xf32> to vector<8x32xf32>
    %283 = vector.extract_strided_slice %278 {offsets = [0, 96], sizes = [8, 32], strides = [1, 1]} : vector<8x128xf32> to vector<8x32xf32>
    %284 = arith.mulf %281, %266 : vector<8x32xf32>
    %285 = arith.mulf %280, %282 : vector<8x32xf32>
    %286 = arith.addf %284, %285 : vector<8x32xf32>
    %287 = math.tanh %286 : vector<8x32xf32>
    %288 = arith.mulf %283, %287 : vector<8x32xf32>
    %c40_81 = arith.constant 40 : index
    %c0_82 = arith.constant 0 : index
    %289 = vector.load %arg13[%c40_81, %c0_82] : memref<56x32xf32, #tpu.memory_space<vmem>>, vector<8x32xf32>
    tpu.vector_store %arg13[%c40_81, %c0_82], %288 {strides = array<i32>} : memref<56x32xf32, #tpu.memory_space<vmem>>, vector<8x32xf32>,
    %c48_83 = arith.constant 48 : index
    %c0_84 = arith.constant 0 : index
    %290 = vector.load %arg12[%c48_83, %c0_84] : memref<56x128xf32, #tpu.memory_space<vmem>>, vector<8x128xf32>
    %291 = arith.truncf %288 : vector<8x32xf32> to vector<8x32xbf16>
    %cst_85 = arith.constant dense<0.000000e+00> : vector<8x128xf32>
    %292 = tpu.matmul %291, %15, %cst_85 {dimension_numbers = #tpu.dot_dimension_numbers<[1], [0], [0], [1], [0, 0, 1, 1], [], []>} : vector<8x32xbf16>, vector<32x128xbf16>, vector<8x128xf32> -> vector<8x128xf32>
    %293 = arith.addf %290, %292 : vector<8x128xf32>
    %294 = arith.negf %293 : vector<8x128xf32>
    %295 = math.exp %294 : vector<8x128xf32>
    %cst_86 = arith.constant 1.000000e+00 : f32
    %296 = vector.broadcast %cst_86 : f32 to vector<8x128xf32>
    %297 = arith.addf %296, %295 : vector<8x128xf32>
    %298 = arith.divf %296, %297 : vector<8x128xf32>
    %299 = math.tanh %293 : vector<8x128xf32>
    %300 = vector.extract_strided_slice %298 {offsets = [0, 0], sizes = [8, 32], strides = [1, 1]} : vector<8x128xf32> to vector<8x32xf32>
    %301 = vector.extract_strided_slice %298 {offsets = [0, 32], sizes = [8, 32], strides = [1, 1]} : vector<8x128xf32> to vector<8x32xf32>
    %302 = vector.extract_strided_slice %299 {offsets = [0, 64], sizes = [8, 32], strides = [1, 1]} : vector<8x128xf32> to vector<8x32xf32>
    %303 = vector.extract_strided_slice %298 {offsets = [0, 96], sizes = [8, 32], strides = [1, 1]} : vector<8x128xf32> to vector<8x32xf32>
    %304 = arith.mulf %301, %286 : vector<8x32xf32>
    %305 = arith.mulf %300, %302 : vector<8x32xf32>
    %306 = arith.addf %304, %305 : vector<8x32xf32>
    %307 = math.tanh %306 : vector<8x32xf32>
    %308 = arith.mulf %303, %307 : vector<8x32xf32>
    %c48_87 = arith.constant 48 : index
    %c0_88 = arith.constant 0 : index
    %309 = vector.load %arg13[%c48_87, %c0_88] : memref<56x32xf32, #tpu.memory_space<vmem>>, vector<8x32xf32>
    tpu.vector_store %arg13[%c48_87, %c0_88], %308 {strides = array<i32>} : memref<56x32xf32, #tpu.memory_space<vmem>>, vector<8x32xf32>,
    %c0_89 = arith.constant 0 : index
    %c0_90 = arith.constant 0 : index
    %310 = vector.load %arg13[%c0_89, %c0_90] : memref<56x32xf32, #tpu.memory_space<vmem>>, vector<56x32xf32>
    %311 = arith.truncf %310 : vector<56x32xf32> to vector<56x32xbf16>
    %c0_91 = arith.constant 0 : index
    %c0_92 = arith.constant 0 : index
    %312 = vector.load %arg8[%c0_91, %c0_92] : memref<32x128xbf16, #tpu.memory_space<vmem>>, vector<32x128xbf16>
    %cst_93 = arith.constant dense<0.000000e+00> : vector<56x128xf32>
    %313 = tpu.matmul %311, %312, %cst_93 {dimension_numbers = #tpu.dot_dimension_numbers<[1], [0], [0], [1], [0, 0, 1, 1], [], []>} : vector<56x32xbf16>, vector<32x128xbf16>, vector<56x128xf32> -> vector<56x128xf32>
    %c0_94 = arith.constant 0 : index
    %c0_95 = arith.constant 0 : index
    %314 = vector.load %arg9[%c0_94, %c0_95] : memref<1x128xf32, #tpu.memory_space<vmem>>, vector<1x128xf32>
    %315 = vector.broadcast %314 : vector<1x128xf32> to vector<56x128xf32>
    %316 = arith.addf %313, %315 : vector<56x128xf32>
    %cst_96 = arith.constant 0.000000e+00 : f32
    %317 = vector.broadcast %cst_96 : f32 to vector<8x128xf32>
    %c0_97 = arith.constant 0 : index
    %c0_98 = arith.constant 0 : index
    %c0_99 = arith.constant 0 : index
    %318 = vector.load %arg10[%c0_97, %c0_98, %c0_99] : memref<8x8x128xf32, #tpu.memory_space<vmem>>, vector<1x8x128xf32>
    %319 = vector.shape_cast %318 : vector<1x8x128xf32> to vector<8x128xf32>
    %320 = vector.shape_cast %317 : vector<8x128xf32> to vector<1x8x128xf32>
    tpu.vector_store %arg10[%c0_97, %c0_98, %c0_99], %320 {strides = array<i32>} : memref<8x8x128xf32, #tpu.memory_space<vmem>>, vector<1x8x128xf32>,
    %321 = vector.shape_cast %316 : vector<56x128xf32> to vector<7x8x128xf32>
    %c1 = arith.constant 1 : index
    %c0_100 = arith.constant 0 : index
    %c0_101 = arith.constant 0 : index
    %322 = vector.load %arg10[%c1, %c0_100, %c0_101] : memref<8x8x128xf32, #tpu.memory_space<vmem>>, vector<7x8x128xf32>
    tpu.vector_store %arg10[%c1, %c0_100, %c0_101], %321 {strides = array<i32>} : memref<8x8x128xf32, #tpu.memory_space<vmem>>, vector<7x8x128xf32>,
    return
  }
}

</mosaic_0001>

<bundles_post_ra>
// kernel: model_forward.1
= control target key start
LH: loop header
LB: loop body
LE: loop exit
PB: predicated region body
PF: predicated region fallthrough
CT: control target
= control target key end

     0   :  { %vm76_vm0 = vcmask 130048   ;;  %v1496_v4 = vmov 0   ;;  %s1497_s21 = smov 64   ;;  %vm231_vm5 = vcmask 261120   ;;  %s1810_s2 = inlined_call_operand.vmem [shape: bf16[16,128], index: 2, kind: input, shape index: {}]   ;;  %s1811_s3 = inlined_call_operand.vmem [shape: bf16[32,128], index: 3, kind: input, shape index: {}]   ;;  %s1812_s0 = inlined_call_operand.vmem [shape: bf16[64,16], index: 0, kind: input, shape index: {}]   ;;  %s1813_s4 = inlined_call_operand.vmem [shape: f32[1,128], index: 4, kind: input, shape index: {}]   ;;  %s1814_s6 = inlined_call_operand.vmem [shape: bf16[32,128], index: 6, kind: input, shape index: {}]   ;;  %s1815_s5 = inlined_call_operand.vmem [shape: bf16[16,128], index: 5, kind: input, shape index: {}]   ;;  %s1816_s1 = inlined_call_operand.vmem [shape: bf16[56,16], index: 1, kind: input, shape index: {}]   ;;  %s1817_s7 = inlined_call_operand.vmem [shape: f32[1,128], index: 7, kind: input, shape index: {}]   ;;  %s1818_s8 = inlined_call_operand.vmem [shape: bf16[32,128], index: 8, kind: input, shape index: {}]   ;;  %s1819_s9 = inlined_call_operand.vmem [shape: f32[1,128], index: 9, kind: input, shape index: {}]   ;;  %s1820_s10 = inlined_call_operand.vmem [shape: f32[8,8,128], index: 10, kind: output, shape index: {}]  }
   0x1   :  { %v1355_v0 = vld [vmem:[%s1810_s2] sm:$0xff]  ;;  %v1561_v1 = vld [vmem:[%s1811_s3 + $0x8] sm:$0xff] }
   0x2   :  { %v1351_v2 = vld [vmem:[%s1812_s0] sm:$0xff]  ;;  %96 = vmatpush.bf16.msra.mxu0 %v1355_v0  ;;  %241 = vmatpush.bf16.msra.mxu2 %v1561_v1  ;;  %v1352_v60 = vld [vmem:[%s1812_s0 + $0x8] sm:$0xff] }
   0x3   :  { %v1570_v3 = vld [vmem:[%s1811_s3] sm:$0xff]  ;;  %300 = vmatpush.bf16.msra.mxu3 %v1561_v1  ;;  %1366 = vmatpush.bf16.msra.mxu1 %v1355_v0 }
   0x4   :  { %v1585_v5 = vld [vmem:[%s1813_s4] ss:$0 sm:$0xff]  ;;  %s1498_s4 = smov 32  }
   0x5   :  { %1263 = vmatmul.msk.bf16.vlgmr.msra.gmra.mxu0 %vm76_vm0, %v1351_v2 }
   0x6   :  { %242 = vmatpush.bf16.msra.mxu2 %v1570_v3 }
   0x7   :  { %301 = vmatpush.bf16.msra.mxu3 %v1570_v3 }
   0x9   :  { %243 = vmatmul.bf16.vlgmr.msra.gmra.mxu2 %v1496_v4 }
   0xa   :  { %359 = vmatpush.bf16.msrb.mxu2 %v1561_v1 }
   0xb   :  { %418 = vmatpush.bf16.msrb.mxu3 %v1561_v1 }
   0xe   :  { %360 = vmatpush.bf16.msrb.mxu2 %v1570_v3 }
   0xf   :  { %419 = vmatpush.bf16.msrb.mxu3 %v1570_v3 }
  0x12   :  { %477 = vmatpush.bf16.msra.mxu2 %v1561_v1 }
  0x15   :  { %1264 = vmatmul.msk.bf16.gmra.mxu0 %vm76_vm0, %v1352_v60 }
  0x16   :  { %478 = vmatpush.bf16.msra.mxu2 %v1570_v3 }
  0x82   :  { %v98_v6 = vpop.f32.mrf.mxu0 }
  0x83   :  { %v99_v7 = vadd.f32 %v1585_v5, %v98_v6 }
  0x8a   :  { %v100_v35 = vpop.f32.mrf.mxu0 }
  0x8b   :  { %v101_v36 = vadd.f32 %v1585_v5, %v100_v35 }
  0x8c   :  { %v244_v8 = vpop.f32.mrf.mxu2 }
  0x8d   :  { %v248_v9 = vadd.f32 %v244_v8, %v99_v7 }
  0x8f   :  { %1376 = vtanh.f32 %v248_v9  ;;  %v1295_v12 = vmul.f32 -1.442695, %v248_v9 }
  0x91   :  { %1378 = vpow2.f32 %v1295_v12 }
  0x92   :  { %v103_v2 = vpop.f32.mrf.mxu0 }
  0x93   :  { %v104_v4 = vadd.f32 %v1585_v5, %v103_v2 }
  0x94   :  { %v246_v10 = vpop.f32.mrf.mxu2 }
  0x95   :  { %v1377_v11 = vpop.eup %1376 }
  0x96   :  { %271 = vrot.lane.b32.xlu0 %v1377_v11, %s1497_s21 }
  0x97   :  { %v1379_v13 = vpop.eup %1378 }
  0x98   :  { %v252_v14 = vadd.f32 1.0, %v1379_v13 }
  0x9a   :  { %1380 = vrcp.f32 %v252_v14  ;;  %v264_v20 = vand.u32 2147483648, %v252_v14  ;;  %vm258_vm2 = vweird.f32 %v252_v14  ;;  %v262_v21 = vand.u32 2147483647, %v252_v14 }
  0x9c   :  { %v265_v23 = vor.u32 1.1754944e-38, %v264_v20  ;;  %vm263_vm4 = vcmp.eq.f32.partialorder %v262_v21, 8.507059e+37 }
  0xa0   :  { %v1381_v15 = vpop.eup %1380 }
  0xa1   :  { %v254_v16 = vmul.f32 %v1381_v15, %v252_v14  ;;  %vm259_vm1 = vweird.f32 %v1381_v15 }
  0xa2   :  { %vm260_vm3 = vmor %vm258_vm2, %vm259_vm1 }
  0xa3   :  { %v255_v17 = vsub.f32 1.0, %v254_v16 }
  0xa5   :  { %v256_v18 = vmul.f32 %v1381_v15, %v255_v17 }
  0xa7   :  { %v257_v19 = vadd.f32 %v1381_v15, %v256_v18 }
  0xa9   :  { %v261_v22 = vsel %vm260_vm3, %v1381_v15, %v257_v19 }
  0xaa   :  { %v266_v25 = vsel %vm263_vm4, %v265_v23, %v261_v22 }
  0xab   :  { %v269_v27 = vmul.f32 0.0, %v266_v25 }
 0x108   :  { %v272_v24 = vpop.permute.xlu0 %271 }
 0x109   :  { %v274_v26 = vmul.f32 %v272_v24, %v266_v25 }
 0x10b   :  { %276 = vrot.lane.b32.xlu0 %v274_v26, %s1498_s4 }
 0x17d   :  { %v277_v28 = vpop.permute.xlu0 %276 }
 0x17e   :  { %v279_v29 = vadd.f32 %v277_v28, %v269_v27 }
 0x180   :  { %1382 = vtanh.f32 %v279_v29 }
 0x186   :  { %v1383_v30 = vpop.eup %1382 }
 0x187   :  { %282 = vrot.lane.b32.xlu1 %v1383_v30, %s1497_s21 }
 0x1f9   :  { %v283_v31 = vpop.permute.xlu1 %282 }
 0x1fa   :  { %v285_v32 = vmul.f32 %v283_v31, %v266_v25 }
 0x1fc   :  { %v287_v33 = vpack.c.bf16 %v285_v32, %v285_v32 }
 0x1fe   :  { %289 = vrot.lane.b32.xlu1 %v287_v33, %s1498_s4  ;;  %v105_v33 = vpop.f32.mrf.mxu0 }
 0x270   :  { %v290_v34 = vpop.permute.xlu1 %289 }
 0x271   :  { %1296 = vmatmul.msk.bf16.vlgmr.msra.gmra.mxu3 %vm231_vm5, %v290_v34  ;;  %v106_v34 = vadd.f32 %v1585_v5, %v105_v33 }
 0x272   :  { %536 = vmatpush.bf16.msra.mxu3 %v1561_v1 }
 0x276   :  { %537 = vmatpush.bf16.msra.mxu3 %v1570_v3 }
 0x2f4   :  { %v303_v37 = vpop.f32.mrf.mxu3 }
 0x2f5   :  { %v307_v38 = vadd.f32 %v303_v37, %v101_v36 }
 0x2f7   :  { %1384 = vtanh.f32 %v307_v38  ;;  %v1297_v41 = vmul.f32 -1.442695, %v307_v38 }
 0x2f9   :  { %1386 = vpow2.f32 %v1297_v41 }
 0x2fc   :  { %v305_v39 = vpop.f32.mrf.mxu3 }
 0x2fd   :  { %v1385_v40 = vpop.eup %1384 }
 0x2fe   :  { %330 = vrot.lane.b32.xlu2 %v1385_v40, %s1497_s21 }
 0x2ff   :  { %v1387_v42 = vpop.eup %1386 }
 0x300   :  { %v311_v43 = vadd.f32 1.0, %v1387_v42 }
 0x302   :  { %1388 = vrcp.f32 %v311_v43  ;;  %v323_v49 = vand.u32 2147483648, %v311_v43  ;;  %vm317_vm7 = vweird.f32 %v311_v43  ;;  %v321_v50 = vand.u32 2147483647, %v311_v43 }
 0x304   :  { %v324_v52 = vor.u32 1.1754944e-38, %v323_v49  ;;  %vm322_vm9 = vcmp.eq.f32.partialorder %v321_v50, 8.507059e+37 }
 0x308   :  { %v1389_v44 = vpop.eup %1388 }
 0x309   :  { %v313_v45 = vmul.f32 %v1389_v44, %v311_v43  ;;  %vm318_vm6 = vweird.f32 %v1389_v44 }
 0x30a   :  { %vm319_vm8 = vmor %vm317_vm7, %vm318_vm6 }
 0x30b   :  { %v314_v46 = vsub.f32 1.0, %v313_v45 }
 0x30d   :  { %v315_v47 = vmul.f32 %v1389_v44, %v314_v46 }
 0x30f   :  { %v316_v48 = vadd.f32 %v1389_v44, %v315_v47 }
 0x311   :  { %v320_v51 = vsel %vm319_vm8, %v1389_v44, %v316_v48 }
 0x312   :  { %v325_v54 = vsel %vm322_vm9, %v324_v52, %v320_v51 }
 0x313   :  { %v328_v56 = vmul.f32 %v325_v54, %v279_v29 }
 0x358   :  { %v331_v53 = vpop.permute.xlu2 %330 }
 0x359   :  { %v333_v55 = vmul.f32 %v331_v53, %v325_v54 }
 0x35b   :  { %335 = vrot.lane.b32.xlu2 %v333_v55, %s1498_s4 }
 0x3b5   :  { %v336_v57 = vpop.permute.xlu2 %335 }
 0x3b6   :  { %v338_v58 = vadd.f32 %v336_v57, %v328_v56  ;;  %v1353_v56 = vld [vmem:[%s1812_s0 + $0x10] sm:$0xff] }
 0x3b7   :  { %1265 = vmatmul.msk.bf16.gmra.mxu0 %vm76_vm0, %v1353_v56 }
 0x3b8   :  { %1390 = vtanh.f32 %v338_v58 }
 0x3be   :  { %v1391_v59 = vpop.eup %1390 }
 0x3bf   :  { %341 = vrot.lane.b32.xlu0 %v1391_v59, %s1497_s21 }
 0x431   :  { %v342_v61 = vpop.permute.xlu0 %341 }
 0x432   :  { %v344_v62 = vmul.f32 %v342_v61, %v325_v54 }
 0x434   :  { %v346_v63 = vpack.c.bf16 %v344_v62, %v344_v62  ;;  %v108_v61 = vpop.f32.mrf.mxu0 }
 0x435   :  { %v109_v62 = vadd.f32 %v1585_v5, %v108_v61 }
 0x436   :  { %348 = vrot.lane.b32.xlu1 %v346_v63, %s1498_s4 }
 0x4a8   :  { %v349_v0 = vpop.permute.xlu1 %348 }
 0x4a9   :  { %1298 = vmatmul.msk.bf16.vlgmr.msrb.gmra.mxu2 %vm231_vm5, %v349_v0 }
 0x4aa   :  { %595 = vmatpush.bf16.msrb.mxu2 %v1561_v1 }
 0x4ae   :  { %596 = vmatpush.bf16.msrb.mxu2 %v1570_v3 }
 0x52c   :  { %v362_v6 = vpop.f32.mrf.mxu2 }
 0x52d   :  { %v366_v7 = vadd.f32 %v362_v6, %v104_v4 }
 0x52f   :  { %1392 = vtanh.f32 %v366_v7  ;;  %v1299_v10 = vmul.f32 -1.442695, %v366_v7 }
 0x531   :  { %1394 = vpow2.f32 %v1299_v10 }
 0x534   :  { %v364_v8 = vpop.f32.mrf.mxu2 }
 0x535   :  { %v1393_v9 = vpop.eup %1392 }
 0x536   :  { %389 = vrot.lane.b32.xlu2 %v1393_v9, %s1497_s21 }
 0x537   :  { %v1395_v11 = vpop.eup %1394 }
 0x538   :  { %v370_v12 = vadd.f32 1.0, %v1395_v11 }
 0x53a   :  { %1396 = vrcp.f32 %v370_v12  ;;  %v382_v18 = vand.u32 2147483648, %v370_v12  ;;  %vm376_vm11 = vweird.f32 %v370_v12  ;;  %v380_v19 = vand.u32 2147483647, %v370_v12 }
 0x53c   :  { %v383_v21 = vor.u32 1.1754944e-38, %v382_v18  ;;  %vm381_vm13 = vcmp.eq.f32.partialorder %v380_v19, 8.507059e+37 }
 0x540   :  { %v1397_v13 = vpop.eup %1396 }
 0x541   :  { %v372_v14 = vmul.f32 %v1397_v13, %v370_v12  ;;  %vm377_vm10 = vweird.f32 %v1397_v13 }
 0x542   :  { %vm378_vm12 = vmor %vm376_vm11, %vm377_vm10 }
 0x543   :  { %v373_v15 = vsub.f32 1.0, %v372_v14 }
 0x545   :  { %v374_v16 = vmul.f32 %v1397_v13, %v373_v15 }
 0x547   :  { %v375_v17 = vadd.f32 %v1397_v13, %v374_v16 }
 0x549   :  { %v379_v20 = vsel %vm378_vm12, %v1397_v13, %v375_v17 }
 0x54a   :  { %v384_v23 = vsel %vm381_vm13, %v383_v21, %v379_v20 }
 0x54b   :  { %v387_v25 = vmul.f32 %v384_v23, %v338_v58 }
 0x590   :  { %v390_v22 = vpop.permute.xlu2 %389 }
 0x591   :  { %v392_v24 = vmul.f32 %v390_v22, %v384_v23 }
 0x593   :  { %394 = vrot.lane.b32.xlu0 %v392_v24, %s1498_s4 }
 0x605   :  { %v395_v26 = vpop.permute.xlu0 %394 }
 0x606   :  { %v397_v27 = vadd.f32 %v395_v26, %v387_v25 }
 0x608   :  { %1398 = vtanh.f32 %v397_v27 }
 0x60e   :  { %v1399_v28 = vpop.eup %1398 }
 0x60f   :  { %400 = vrot.lane.b32.xlu1 %v1399_v28, %s1497_s21 }
 0x681   :  { %v401_v29 = vpop.permute.xlu1 %400 }
 0x682   :  { %v403_v30 = vmul.f32 %v401_v29, %v384_v23  ;;  %v110_v29 = vpop.f32.mrf.mxu0 }
 0x684   :  { %v405_v31 = vpack.c.bf16 %v403_v30, %v403_v30  ;;  %v111_v30 = vadd.f32 %v1585_v5, %v110_v29 }
 0x686   :  { %407 = vrot.lane.b32.xlu2 %v405_v31, %s1498_s4 }
 0x6e0   :  { %v408_v32 = vpop.permute.xlu2 %407 }
 0x6e1   :  { %1300 = vmatmul.msk.bf16.vlgmr.msrb.gmra.mxu3 %vm231_vm5, %v408_v32 }
 0x6e2   :  { %654 = vmatpush.bf16.msrb.mxu3 %v1561_v1 }
 0x6e6   :  { %655 = vmatpush.bf16.msrb.mxu3 %v1570_v3 }
 0x764   :  { %v421_v35 = vpop.f32.mrf.mxu3 }
 0x765   :  { %v425_v36 = vadd.f32 %v421_v35, %v106_v34 }
 0x767   :  { %1400 = vtanh.f32 %v425_v36  ;;  %v1301_v39 = vmul.f32 -1.442695, %v425_v36 }
 0x769   :  { %1402 = vpow2.f32 %v1301_v39 }
 0x76c   :  { %v423_v37 = vpop.f32.mrf.mxu3 }
 0x76d   :  { %v1401_v38 = vpop.eup %1400 }
 0x76e   :  { %448 = vrot.lane.b32.xlu0 %v1401_v38, %s1497_s21 }
 0x76f   :  { %v1403_v40 = vpop.eup %1402 }
 0x770   :  { %v429_v41 = vadd.f32 1.0, %v1403_v40 }
 0x772   :  { %1404 = vrcp.f32 %v429_v41  ;;  %v441_v45 = vand.u32 2147483648, %v429_v41  ;;  %vm435_vm15 = vweird.f32 %v429_v41  ;;  %v439_v46 = vand.u32 2147483647, %v429_v41 }
 0x774   :  { %v442_v48 = vor.u32 1.1754944e-38, %v441_v45  ;;  %vm440_vm2 = vcmp.eq.f32.partialorder %v439_v46, 8.507059e+37 }
 0x778   :  { %v1405_v42 = vpop.eup %1404 }
 0x779   :  { %v431_v43 = vmul.f32 %v1405_v42, %v429_v41  ;;  %vm436_vm14 = vweird.f32 %v1405_v42 }
 0x77a   :  { %vm437_vm1 = vmor %vm435_vm15, %vm436_vm14 }
 0x77b   :  { %v432_v1 = vsub.f32 1.0, %v431_v43 }
 0x77d   :  { %v433_v44 = vmul.f32 %v1405_v42, %v432_v1 }
 0x77f   :  { %v434_v3 = vadd.f32 %v1405_v42, %v433_v44 }
 0x781   :  { %v438_v47 = vsel %vm437_vm1, %v1405_v42, %v434_v3 }
 0x782   :  { %v443_v50 = vsel %vm440_vm2, %v442_v48, %v438_v47 }
 0x783   :  { %v446_v52 = vmul.f32 %v443_v50, %v397_v27 }
 0x7e0   :  { %v449_v49 = vpop.permute.xlu0 %448 }
 0x7e1   :  { %v451_v51 = vmul.f32 %v449_v49, %v443_v50 }
 0x7e3   :  { %453 = vrot.lane.b32.xlu1 %v451_v51, %s1498_s4 }
 0x855   :  { %v454_v53 = vpop.permute.xlu1 %453 }
 0x856   :  { %v456_v54 = vadd.f32 %v454_v53, %v446_v52  ;;  %v1354_v52 = vld [vmem:[%s1812_s0 + $0x18] sm:$0xff] }
 0x857   :  { %1266 = vmatmul.msk.bf16.vlgmr.msra.gmra.mxu1 %vm76_vm0, %v1354_v52 }
 0x858   :  { %1406 = vtanh.f32 %v456_v54 }
 0x85e   :  { %v1407_v55 = vpop.eup %1406 }
 0x85f   :  { %459 = vrot.lane.b32.xlu2 %v1407_v55, %s1497_s21 }
 0x8b9   :  { %v460_v57 = vpop.permute.xlu2 %459 }
 0x8ba   :  { %v462_v58 = vmul.f32 %v460_v57, %v443_v50 }
 0x8bc   :  { %v464_v59 = vpack.c.bf16 %v462_v58, %v462_v58 }
 0x8be   :  { %466 = vrot.lane.b32.xlu0 %v464_v59, %s1498_s4 }
 0x8d4   :  { %v113_v57 = vpop.f32.mrf.mxu1 }
 0x8d5   :  { %v114_v58 = vadd.f32 %v1585_v5, %v113_v57 }
 0x930   :  { %v467_v60 = vpop.permute.xlu0 %466 }
 0x931   :  { %1302 = vmatmul.msk.bf16.vlgmr.msra.gmra.mxu2 %vm231_vm5, %v467_v60 }
 0x9b4   :  { %v480_v63 = vpop.f32.mrf.mxu2 }
 0x9b5   :  { %v484_v0 = vadd.f32 %v480_v63, %v109_v62 }
 0x9b7   :  { %1408 = vtanh.f32 %v484_v0  ;;  %v1303_v6 = vmul.f32 -1.442695, %v484_v0 }
 0x9b9   :  { %1410 = vpow2.f32 %v1303_v6 }
 0x9bc   :  { %v482_v2 = vpop.f32.mrf.mxu2 }
 0x9bd   :  { %v1409_v4 = vpop.eup %1408 }
 0x9be   :  { %507 = vrot.lane.b32.xlu1 %v1409_v4, %s1497_s21 }
 0x9bf   :  { %v1411_v7 = vpop.eup %1410 }
 0x9c0   :  { %v488_v8 = vadd.f32 1.0, %v1411_v7 }
 0x9c2   :  { %1412 = vrcp.f32 %v488_v8  ;;  %v500_v14 = vand.u32 2147483648, %v488_v8  ;;  %vm494_vm4 = vweird.f32 %v488_v8  ;;  %v498_v15 = vand.u32 2147483647, %v488_v8 }
 0x9c4   :  { %v501_v17 = vor.u32 1.1754944e-38, %v500_v14  ;;  %vm499_vm7 = vcmp.eq.f32.partialorder %v498_v15, 8.507059e+37 }
 0x9c8   :  { %v1413_v9 = vpop.eup %1412 }
 0x9c9   :  { %v490_v10 = vmul.f32 %v1413_v9, %v488_v8  ;;  %vm495_vm3 = vweird.f32 %v1413_v9 }
 0x9ca   :  { %vm496_vm6 = vmor %vm494_vm4, %vm495_vm3 }
 0x9cb   :  { %v491_v11 = vsub.f32 1.0, %v490_v10 }
 0x9cd   :  { %v492_v12 = vmul.f32 %v1413_v9, %v491_v11 }
 0x9cf   :  { %v493_v13 = vadd.f32 %v1413_v9, %v492_v12 }
 0x9d1   :  { %v497_v16 = vsel %vm496_vm6, %v1413_v9, %v493_v13 }
 0x9d2   :  { %v502_v19 = vsel %vm499_vm7, %v501_v17, %v497_v16 }
 0x9d3   :  { %v505_v21 = vmul.f32 %v502_v19, %v456_v54 }
 0xa30   :  { %v508_v18 = vpop.permute.xlu1 %507 }
 0xa31   :  { %v510_v20 = vmul.f32 %v508_v18, %v502_v19 }
 0xa33   :  { %512 = vrot.lane.b32.xlu2 %v510_v20, %s1498_s4 }
 0xa8d   :  { %v513_v22 = vpop.permute.xlu2 %512 }
 0xa8e   :  { %v515_v23 = vadd.f32 %v513_v22, %v505_v21 }
 0xa90   :  { %1414 = vtanh.f32 %v515_v23 }
 0xa96   :  { %v1415_v24 = vpop.eup %1414 }
 0xa97   :  { %518 = vrot.lane.b32.xlu0 %v1415_v24, %s1497_s21 }
 0xb09   :  { %v519_v25 = vpop.permute.xlu0 %518 }
 0xb0a   :  { %v521_v26 = vmul.f32 %v519_v25, %v502_v19  ;;  %v115_v25 = vpop.f32.mrf.mxu1 }
 0xb0c   :  { %v523_v27 = vpack.c.bf16 %v521_v26, %v521_v26  ;;  %v116_v26 = vadd.f32 %v1585_v5, %v115_v25 }
 0xb0e   :  { %525 = vrot.lane.b32.xlu1 %v523_v27, %s1498_s4 }
 0xb80   :  { %v526_v28 = vpop.permute.xlu1 %525 }
 0xb81   :  { %1304 = vmatmul.msk.bf16.vlgmr.msra.gmra.mxu3 %vm231_vm5, %v526_v28 }
 0xc04   :  { %v539_v31 = vpop.f32.mrf.mxu3 }
 0xc05   :  { %v543_v32 = vadd.f32 %v539_v31, %v111_v30 }
 0xc07   :  { %1416 = vtanh.f32 %v543_v32  ;;  %v1305_v35 = vmul.f32 -1.442695, %v543_v32 }
 0xc09   :  { %1418 = vpow2.f32 %v1305_v35 }
 0xc0c   :  { %v541_v33 = vpop.f32.mrf.mxu3 }
 0xc0d   :  { %v1417_v34 = vpop.eup %1416 }
 0xc0e   :  { %566 = vrot.lane.b32.xlu2 %v1417_v34, %s1497_s21 }
 0xc0f   :  { %v1419_v36 = vpop.eup %1418 }
 0xc10   :  { %v547_v37 = vadd.f32 1.0, %v1419_v36 }
 0xc12   :  { %1420 = vrcp.f32 %v547_v37  ;;  %v559_v43 = vand.u32 2147483648, %v547_v37  ;;  %vm553_vm9 = vweird.f32 %v547_v37  ;;  %v557_v1 = vand.u32 2147483647, %v547_v37 }
 0xc14   :  { %v560_v3 = vor.u32 1.1754944e-38, %v559_v43  ;;  %vm558_vm11 = vcmp.eq.f32.partialorder %v557_v1, 8.507059e+37 }
 0xc18   :  { %v1421_v38 = vpop.eup %1420 }
 0xc19   :  { %v549_v39 = vmul.f32 %v1421_v38, %v547_v37  ;;  %vm554_vm8 = vweird.f32 %v1421_v38 }
 0xc1a   :  { %vm555_vm10 = vmor %vm553_vm9, %vm554_vm8 }
 0xc1b   :  { %v550_v40 = vsub.f32 1.0, %v549_v39 }
 0xc1d   :  { %v551_v41 = vmul.f32 %v1421_v38, %v550_v40 }
 0xc1f   :  { %v552_v42 = vadd.f32 %v1421_v38, %v551_v41 }
 0xc21   :  { %v556_v44 = vsel %vm555_vm10, %v1421_v38, %v552_v42 }
 0xc22   :  { %v561_v46 = vsel %vm558_vm11, %v560_v3, %v556_v44 }
 0xc23   :  { %v564_v48 = vmul.f32 %v561_v46, %v515_v23 }
 0xc68   :  { %v567_v45 = vpop.permute.xlu2 %566 }
 0xc69   :  { %v569_v47 = vmul.f32 %v567_v45, %v561_v46 }
 0xc6b   :  { %571 = vrot.lane.b32.xlu0 %v569_v47, %s1498_s4  ;;  %v1363_v47 = vld [vmem:[%s1814_s6 + $0x8] sm:$0xff] }
 0xc6c   :  { %725 = vmatpush.bf16.msrb.mxu0 %v1363_v47  ;;  %853 = vmatpush.bf16.msra.mxu2 %v1363_v47 }
 0xc6d   :  { %917 = vmatpush.bf16.msra.mxu3 %v1363_v47 }
 0xcdd   :  { %v572_v49 = vpop.permute.xlu0 %571 }
 0xcde   :  { %v574_v50 = vadd.f32 %v572_v49, %v564_v48  ;;  %v1359_v48 = vld [vmem:[%s1815_s5] sm:$0xff] }
 0xcdf   :  { %v1356_v49 = vld [vmem:[%s1816_s1] sm:$0xff]  ;;  %182 = vmatpush.bf16.msrb.mxu1 %v1359_v48 }
 0xce0   :  { %1422 = vtanh.f32 %v574_v50 }
 0xce2   :  { %1283 = vmatmul.msk.bf16.vlgmr.msrb.gmra.mxu1 %vm76_vm0, %v1356_v49 }
 0xce3   :  { %789 = vmatpush.bf16.msra.mxu1 %v1363_v47 }
 0xce6   :  { %v1423_v51 = vpop.eup %1422 }
 0xce7   :  { %577 = vrot.lane.b32.xlu1 %v1423_v51, %s1497_s21 }
 0xd59   :  { %v578_v53 = vpop.permute.xlu1 %577 }
 0xd5a   :  { %v580_v54 = vmul.f32 %v578_v53, %v561_v46 }
 0xd5c   :  { %v582_v55 = vpack.c.bf16 %v580_v54, %v580_v54 }
 0xd5e   :  { %584 = vrot.lane.b32.xlu2 %v582_v55, %s1498_s4  ;;  %v1672_v55 = vld [vmem:[%s1817_s7] ss:$0 sm:$0xff] }
 0xdb8   :  { %v585_v56 = vpop.permute.xlu2 %584 }
 0xdb9   :  { %1306 = vmatmul.msk.bf16.vlgmr.msrb.gmra.mxu2 %vm231_vm5, %v585_v56  ;;  %v184_v56 = vpop.f32.mrf.mxu1 }
 0xdba   :  { %v185_v57 = vadd.f32 %v1672_v55, %v184_v56 }
 0xe3c   :  { %v598_v59 = vpop.f32.mrf.mxu2 }
 0xe3d   :  { %v602_v60 = vadd.f32 %v598_v59, %v114_v58 }
 0xe3f   :  { %1424 = vtanh.f32 %v602_v60  ;;  %v1307_v63 = vmul.f32 -1.442695, %v602_v60 }
 0xe41   :  { %1426 = vpow2.f32 %v1307_v63 }
 0xe44   :  { %v600_v61 = vpop.f32.mrf.mxu2 }
 0xe45   :  { %v1425_v62 = vpop.eup %1424 }
 0xe46   :  { %625 = vrot.lane.b32.xlu0 %v1425_v62, %s1497_s21 }
 0xe47   :  { %v1427_v0 = vpop.eup %1426 }
 0xe48   :  { %v606_v2 = vadd.f32 1.0, %v1427_v0 }
 0xe4a   :  { %1428 = vrcp.f32 %v606_v2  ;;  %v618_v10 = vand.u32 2147483648, %v606_v2  ;;  %vm612_vm13 = vweird.f32 %v606_v2  ;;  %v616_v11 = vand.u32 2147483647, %v606_v2 }
 0xe4c   :  { %v619_v13 = vor.u32 1.1754944e-38, %v618_v10  ;;  %vm617_vm15 = vcmp.eq.f32.partialorder %v616_v11, 8.507059e+37 }
 0xe50   :  { %v1429_v4 = vpop.eup %1428 }
 0xe51   :  { %v608_v6 = vmul.f32 %v1429_v4, %v606_v2  ;;  %vm613_vm12 = vweird.f32 %v1429_v4 }
 0xe52   :  { %vm614_vm14 = vmor %vm612_vm13, %vm613_vm12 }
 0xe53   :  { %v609_v7 = vsub.f32 1.0, %v608_v6 }
 0xe55   :  { %v610_v8 = vmul.f32 %v1429_v4, %v609_v7 }
 0xe57   :  { %v611_v9 = vadd.f32 %v1429_v4, %v610_v8 }
 0xe59   :  { %v615_v12 = vsel %vm614_vm14, %v1429_v4, %v611_v9 }
 0xe5a   :  { %v620_v15 = vsel %vm617_vm15, %v619_v13, %v615_v12 }
 0xe5b   :  { %v623_v17 = vmul.f32 %v620_v15, %v574_v50  ;;  %v1362_v50 = vld [vmem:[%s1814_s6] sm:$0xff] }
 0xe5c   :  { %726 = vmatpush.bf16.msrb.mxu0 %v1362_v50  ;;  %790 = vmatpush.bf16.msra.mxu1 %v1362_v50 }
 0xe5d   :  { %854 = vmatpush.bf16.msra.mxu2 %v1362_v50  ;;  %918 = vmatpush.bf16.msra.mxu3 %v1362_v50 }
 0xe60   :  { %981 = vmatpush.bf16.msra.mxu0 %v1363_v47  ;;  %1045 = vmatpush.bf16.msrb.mxu1 %v1363_v47 }
 0xe61   :  { %1109 = vmatpush.bf16.msrb.mxu2 %v1363_v47 }
 0xe64   :  { %982 = vmatpush.bf16.msra.mxu0 %v1362_v50  ;;  %1046 = vmatpush.bf16.msrb.mxu1 %v1362_v50 }
 0xe65   :  { %1110 = vmatpush.bf16.msrb.mxu2 %v1362_v50 }
 0xeb8   :  { %v626_v14 = vpop.permute.xlu0 %625 }
 0xeb9   :  { %v628_v16 = vmul.f32 %v626_v14, %v620_v15 }
 0xebb   :  { %630 = vrot.lane.b32.xlu1 %v628_v16, %s1498_s4 }
 0xf2d   :  { %v631_v18 = vpop.permute.xlu1 %630 }
 0xf2e   :  { %v633_v19 = vadd.f32 %v631_v18, %v623_v17 }
 0xf30   :  { %1430 = vtanh.f32 %v633_v19 }
 0xf36   :  { %v1431_v20 = vpop.eup %1430 }
 0xf37   :  { %636 = vrot.lane.b32.xlu2 %v1431_v20, %s1497_s21  ;;  %v1357_v20 = vld [vmem:[%s1816_s1 + $0x8] sm:$0xff] }
 0xf38   :  { %1284 = vmatmul.msk.bf16.gmra.mxu1 %vm76_vm0, %v1357_v20 }
 0xf91   :  { %v637_v21 = vpop.permute.xlu2 %636 }
 0xf92   :  { %v639_v22 = vmul.f32 %v637_v21, %v620_v15  ;;  %v1358_v21 = vld [vmem:[%s1816_s1 + $0x10] sm:$0xff] }
 0xf93   :  { %1285 = vmatmul.msk.bf16.gmra.mxu1 %vm76_vm0, %v1358_v21 }
 0xf94   :  { %v641_v23 = vpack.c.bf16 %v639_v22, %v639_v22  ;;  %v132_v22 = vld [vmem:[%s1816_s1 + $0x18] sm:$0xf] }
 0xf96   :  { %643 = vrot.lane.b32.xlu0 %v641_v23, %s1498_s4  ;;  %v152_v23 = vunpack.c.l.b16 %v132_v22 }
0x1008   :  { %v644_v24 = vpop.permute.xlu0 %643 }
0x1009   :  { %1308 = vmatmul.msk.bf16.vlgmr.msrb.gmra.mxu3 %vm231_vm5, %v644_v24 }
0x108c   :  { %v657_v27 = vpop.f32.mrf.mxu3 }
0x108d   :  { %v661_v28 = vadd.f32 %v657_v27, %v116_v26  ;;  %v156_v27 = vpack.c.b16 %v152_v23, %v152_v23 }
0x108f   :  { %1432 = vtanh.f32 %v661_v28  ;;  %v1309_v31 = vmul.f32 -1.442695, %v661_v28  ;;  %1286 = vmatmul.msk.bf16.gmra.mxu1 %vm76_vm0, %v156_v27  ;;  %v186_v28 = vpop.f32.mrf.mxu1 }
0x1091   :  { %1434 = vpow2.f32 %v1309_v31 }
0x1094   :  { %v659_v29 = vpop.f32.mrf.mxu3 }
0x1095   :  { %v1433_v30 = vpop.eup %1432 }
0x1096   :  { %684 = vrot.lane.b32.xlu1 %v1433_v30, %s1497_s21 }
0x1097   :  { %v1435_v32 = vpop.eup %1434  ;;  %v189_v30 = vpop.f32.mrf.mxu1 }
0x1098   :  { %v665_v33 = vadd.f32 1.0, %v1435_v32 }
0x109a   :  { %1436 = vrcp.f32 %v665_v33  ;;  %v677_v39 = vand.u32 2147483648, %v665_v33  ;;  %vm671_vm2 = vweird.f32 %v665_v33  ;;  %v675_v5 = vand.u32 2147483647, %v665_v33 }
0x109c   :  { %v678_v41 = vor.u32 1.1754944e-38, %v677_v39  ;;  %vm676_vm4 = vcmp.eq.f32.partialorder %v675_v5, 8.507059e+37 }
0x109f   :  { %v1697_v31 = vpop.f32.mrf.mxu1 }
0x10a0   :  { %v1437_v34 = vpop.eup %1436 }
0x10a1   :  { %v667_v35 = vmul.f32 %v1437_v34, %v665_v33  ;;  %vm672_vm1 = vweird.f32 %v1437_v34 }
0x10a2   :  { %vm673_vm3 = vmor %vm671_vm2, %vm672_vm1 }
0x10a3   :  { %v668_v36 = vsub.f32 1.0, %v667_v35 }
0x10a5   :  { %v669_v37 = vmul.f32 %v1437_v34, %v668_v36  ;;  %v187_v36 = vadd.f32 %v1672_v55, %v186_v28 }
0x10a7   :  { %v670_v38 = vadd.f32 %v1437_v34, %v669_v37  ;;  %v1699_v32 = vpop.f32.mrf.mxu1 }
0x10a9   :  { %v674_v40 = vsel %vm673_vm3, %v1437_v34, %v670_v38 }
0x10aa   :  { %v679_v43 = vsel %vm676_vm4, %v678_v41, %v674_v40 }
0x10ab   :  { %v682_v44 = vmul.f32 %v679_v43, %v633_v19 }
0x10af   :  { %v1701_v33 = vpop.f32.mrf.mxu1 }
0x1108   :  { %v685_v42 = vpop.permute.xlu1 %684 }
0x1109   :  { %v687_v1 = vmul.f32 %v685_v42, %v679_v43 }
0x110b   :  { %689 = vrot.lane.b32.xlu2 %v687_v1, %s1498_s4 }
0x110c   :  { %v1703_v34 = vpop.f32.mrf.mxu1 }
0x1114   :  { %v201_v35 = vpop.f32.mrf.mxu1 }
0x1165   :  { %v690_v3 = vpop.permute.xlu2 %689 }
0x1166   :  { %v1650_v45 = vadd.f32 %v690_v3, %v682_v44 }
0x1168   :  { %1438 = vtanh.f32 %v1650_v45 }
0x116e   :  { %v1439_v46 = vpop.eup %1438 }
0x116f   :  { %695 = vrot.lane.b32.xlu0 %v1439_v46, %s1497_s21 }
0x11e1   :  { %v696_v51 = vpop.permute.xlu0 %695 }
0x11e2   :  { %v698_v52 = vmul.f32 %v696_v51, %v679_v43 }
0x11e4   :  { %v700_v53 = vpack.c.bf16 %v698_v52, %v698_v52 }
0x11e6   :  { %702 = vrot.lane.b32.xlu1 %v700_v53, %s1498_s4 }
0x1258   :  { %v703_v54 = vpop.permute.xlu1 %702 }
0x1259   :  { %1318 = vmatmul.msk.bf16.vlgmr.msrb.gmra.mxu0 %vm231_vm5, %v703_v54 }
0x12d6   :  { %v728_v58 = vpop.f32.mrf.mxu0 }
0x12d7   :  { %v732_v59 = vadd.f32 %v728_v58, %v185_v57 }
0x12d9   :  { %1440 = vtanh.f32 %v732_v59  ;;  %v1319_v62 = vmul.f32 -1.442695, %v732_v59 }
0x12db   :  { %1442 = vpow2.f32 %v1319_v62  ;;  %v190_v62 = vadd.f32 %v1672_v55, %v189_v30  ;;  %v192_v30 = vadd.f32 %v1672_v55, %v1697_v31 }
0x12de   :  { %v730_v60 = vpop.f32.mrf.mxu0 }
0x12df   :  { %v1441_v61 = vpop.eup %1440 }
0x12e0   :  { %755 = vrot.lane.b32.xlu2 %v1441_v61, %s1497_s21 }
0x12e1   :  { %v1443_v63 = vpop.eup %1442 }
0x12e2   :  { %v736_v0 = vadd.f32 1.0, %v1443_v63 }
0x12e4   :  { %1444 = vrcp.f32 %v736_v0  ;;  %v748_v9 = vand.u32 2147483648, %v736_v0  ;;  %vm742_vm7 = vweird.f32 %v736_v0  ;;  %v746_v10 = vand.u32 2147483647, %v736_v0 }
0x12e6   :  { %v749_v12 = vor.u32 1.1754944e-38, %v748_v9  ;;  %vm747_vm9 = vcmp.eq.f32.partialorder %v746_v10, 8.507059e+37 }
0x12ea   :  { %v1445_v2 = vpop.eup %1444 }
0x12eb   :  { %v738_v4 = vmul.f32 %v1445_v2, %v736_v0  ;;  %vm743_vm6 = vweird.f32 %v1445_v2 }
0x12ec   :  { %vm744_vm8 = vmor %vm742_vm7, %vm743_vm6 }
0x12ed   :  { %v739_v6 = vsub.f32 1.0, %v738_v4 }
0x12ef   :  { %v740_v7 = vmul.f32 %v1445_v2, %v739_v6 }
0x12f1   :  { %v741_v8 = vadd.f32 %v1445_v2, %v740_v7 }
0x12f3   :  { %v745_v11 = vsel %vm744_vm8, %v1445_v2, %v741_v8 }
0x12f4   :  { %v750_v14 = vsel %vm747_vm9, %v749_v12, %v745_v11 }
0x12f5   :  { %v753_v16 = vmul.f32 %v750_v14, %v1650_v45 }
0x133a   :  { %v756_v13 = vpop.permute.xlu2 %755 }
0x133b   :  { %v758_v15 = vmul.f32 %v756_v13, %v750_v14 }
0x133d   :  { %760 = vrot.lane.b32.xlu0 %v758_v15, %s1498_s4 }
0x13af   :  { %v761_v17 = vpop.permute.xlu0 %760 }
0x13b0   :  { %v763_v18 = vadd.f32 %v761_v17, %v753_v16 }
0x13b2   :  { %1446 = vtanh.f32 %v763_v18 }
0x13b8   :  { %v1447_v19 = vpop.eup %1446 }
0x13b9   :  { %766 = vrot.lane.b32.xlu1 %v1447_v19, %s1497_s21 }
0x142b   :  { %v767_v24 = vpop.permute.xlu1 %766 }
0x142c   :  { %v1690_v25 = vmul.f32 %v767_v24, %v750_v14 }
0x142e   :  { %v776_v26 = vpack.c.bf16 %v1690_v25, %v1690_v25 }
0x1430   :  { %778 = vrot.lane.b32.xlu2 %v776_v26, %s1498_s4 }
0x148a   :  { %v779_v29 = vpop.permute.xlu2 %778 }
0x148b   :  { %1320 = vmatmul.msk.bf16.vlgmr.msra.gmra.mxu1 %vm231_vm5, %v779_v29 }
0x1508   :  { %v792_v37 = vpop.f32.mrf.mxu1 }
0x1509   :  { %v796_v38 = vadd.f32 %v792_v37, %v187_v36 }
0x150b   :  { %1448 = vtanh.f32 %v796_v38  ;;  %v1321_v40 = vmul.f32 -1.442695, %v796_v38 }
0x150d   :  { %1450 = vpow2.f32 %v1321_v40 }
0x1510   :  { %v794_v39 = vpop.f32.mrf.mxu1 }
0x1511   :  { %v1449_v5 = vpop.eup %1448 }
0x1512   :  { %819 = vrot.lane.b32.xlu0 %v1449_v5, %s1497_s21 }
0x1513   :  { %v1451_v41 = vpop.eup %1450 }
0x1514   :  { %v800_v42 = vadd.f32 1.0, %v1451_v41 }
0x1516   :  { %1452 = vrcp.f32 %v800_v42  ;;  %v812_v46 = vand.u32 2147483648, %v800_v42  ;;  %vm806_vm10 = vweird.f32 %v800_v42  ;;  %v810_v47 = vand.u32 2147483647, %v800_v42 }
0x1518   :  { %v813_v49 = vor.u32 1.1754944e-38, %v812_v46  ;;  %vm811_vm12 = vcmp.eq.f32.partialorder %v810_v47, 8.507059e+37 }
0x151c   :  { %v1453_v43 = vpop.eup %1452 }
0x151d   :  { %v802_v1 = vmul.f32 %v1453_v43, %v800_v42  ;;  %vm807_vm0 = vweird.f32 %v1453_v43 }
0x151e   :  { %vm808_vm11 = vmor %vm806_vm10, %vm807_vm0 }
0x151f   :  { %v803_v44 = vsub.f32 1.0, %v802_v1 }
0x1521   :  { %v804_v3 = vmul.f32 %v1453_v43, %v803_v44 }
0x1523   :  { %v805_v45 = vadd.f32 %v1453_v43, %v804_v3 }
0x1525   :  { %v809_v48 = vsel %vm808_vm11, %v1453_v43, %v805_v45 }
0x1526   :  { %v814_v51 = vsel %vm811_vm12, %v813_v49, %v809_v48 }
0x1527   :  { %v817_v53 = vmul.f32 %v814_v51, %v763_v18 }
0x1584   :  { %v820_v50 = vpop.permute.xlu0 %819 }
0x1585   :  { %v822_v52 = vmul.f32 %v820_v50, %v814_v51 }
0x1587   :  { %824 = vrot.lane.b32.xlu1 %v822_v52, %s1498_s4 }
0x15f9   :  { %v825_v54 = vpop.permute.xlu1 %824 }
0x15fa   :  { %v827_v56 = vadd.f32 %v825_v54, %v817_v53 }
0x15fc   :  { %1454 = vtanh.f32 %v827_v56 }
0x1602   :  { %v1455_v57 = vpop.eup %1454 }
0x1603   :  { %830 = vrot.lane.b32.xlu2 %v1455_v57, %s1497_s21 }
0x165d   :  { %v831_v58 = vpop.permute.xlu2 %830 }
0x165e   :  { %v1709_v59 = vmul.f32 %v831_v58, %v814_v51 }
0x1660   :  { %v840_v60 = vpack.c.bf16 %v1709_v59, %v1709_v59 }
0x1662   :  { %842 = vrot.lane.b32.xlu0 %v840_v60, %s1498_s4  ;;  %v195_v60 = vadd.f32 %v1672_v55, %v1699_v32 }
0x16d4   :  { %v843_v61 = vpop.permute.xlu0 %842 }
0x16d5   :  { %1322 = vmatmul.msk.bf16.vlgmr.msra.gmra.mxu2 %vm231_vm5, %v843_v61 }
0x1758   :  { %v856_v63 = vpop.f32.mrf.mxu2 }
0x1759   :  { %v860_v0 = vadd.f32 %v856_v63, %v190_v62 }
0x175b   :  { %1456 = vtanh.f32 %v860_v0  ;;  %v1323_v6 = vmul.f32 -1.442695, %v860_v0 }
0x175d   :  { %1458 = vpow2.f32 %v1323_v6 }
0x1760   :  { %v858_v2 = vpop.f32.mrf.mxu2 }
0x1761   :  { %v1457_v4 = vpop.eup %1456 }
0x1762   :  { %883 = vrot.lane.b32.xlu1 %v1457_v4, %s1497_s21 }
0x1763   :  { %v1459_v7 = vpop.eup %1458 }
0x1764   :  { %v864_v8 = vadd.f32 1.0, %v1459_v7 }
0x1766   :  { %1460 = vrcp.f32 %v864_v8  ;;  %v876_v14 = vand.u32 2147483648, %v864_v8  ;;  %vm870_vm14 = vweird.f32 %v864_v8  ;;  %v874_v15 = vand.u32 2147483647, %v864_v8 }
0x1768   :  { %v877_v17 = vor.u32 1.1754944e-38, %v876_v14  ;;  %vm875_vm1 = vcmp.eq.f32.partialorder %v874_v15, 8.507059e+37 }
0x176c   :  { %v1461_v9 = vpop.eup %1460 }
0x176d   :  { %v866_v10 = vmul.f32 %v1461_v9, %v864_v8  ;;  %vm871_vm13 = vweird.f32 %v1461_v9 }
0x176e   :  { %vm872_vm15 = vmor %vm870_vm14, %vm871_vm13 }
0x176f   :  { %v867_v11 = vsub.f32 1.0, %v866_v10 }
0x1771   :  { %v868_v12 = vmul.f32 %v1461_v9, %v867_v11 }
0x1773   :  { %v869_v13 = vadd.f32 %v1461_v9, %v868_v12 }
0x1775   :  { %v873_v16 = vsel %vm872_vm15, %v1461_v9, %v869_v13 }
0x1776   :  { %v878_v19 = vsel %vm875_vm1, %v877_v17, %v873_v16 }
0x1777   :  { %v881_v21 = vmul.f32 %v878_v19, %v827_v56 }
0x17d4   :  { %v884_v18 = vpop.permute.xlu1 %883 }
0x17d5   :  { %v886_v20 = vmul.f32 %v884_v18, %v878_v19 }
0x17d7   :  { %888 = vrot.lane.b32.xlu2 %v886_v20, %s1498_s4 }
0x1831   :  { %v889_v22 = vpop.permute.xlu2 %888 }
0x1832   :  { %v891_v23 = vadd.f32 %v889_v22, %v881_v21 }
0x1834   :  { %1462 = vtanh.f32 %v891_v23 }
0x183a   :  { %v1463_v24 = vpop.eup %1462 }
0x183b   :  { %894 = vrot.lane.b32.xlu0 %v1463_v24, %s1497_s21 }
0x18ad   :  { %v895_v26 = vpop.permute.xlu0 %894 }
0x18ae   :  { %v1719_v27 = vmul.f32 %v895_v26, %v878_v19 }
0x18b0   :  { %v904_v28 = vpack.c.bf16 %v1719_v27, %v1719_v27 }
0x18b2   :  { %906 = vrot.lane.b32.xlu1 %v904_v28, %s1498_s4  ;;  %v197_v28 = vadd.f32 %v1672_v55, %v1701_v33 }
0x1924   :  { %v907_v29 = vpop.permute.xlu1 %906 }
0x1925   :  { %1324 = vmatmul.msk.bf16.vlgmr.msra.gmra.mxu3 %vm231_vm5, %v907_v29 }
0x19a8   :  { %v920_v35 = vpop.f32.mrf.mxu3 }
0x19a9   :  { %v924_v36 = vadd.f32 %v920_v35, %v192_v30 }
0x19ab   :  { %1464 = vtanh.f32 %v924_v36  ;;  %v1325_v39 = vmul.f32 -1.442695, %v924_v36 }
0x19ad   :  { %1466 = vpow2.f32 %v1325_v39 }
0x19b0   :  { %v922_v37 = vpop.f32.mrf.mxu3 }
0x19b1   :  { %v1465_v38 = vpop.eup %1464 }
0x19b2   :  { %947 = vrot.lane.b32.xlu2 %v1465_v38, %s1497_s21 }
0x19b3   :  { %v1467_v5 = vpop.eup %1466 }
0x19b4   :  { %v928_v40 = vadd.f32 1.0, %v1467_v5 }
0x19b6   :  { %1468 = vrcp.f32 %v928_v40  ;;  %v940_v3 = vand.u32 2147483648, %v928_v40  ;;  %vm934_vm3 = vweird.f32 %v928_v40  ;;  %v938_v31 = vand.u32 2147483647, %v928_v40 }
0x19b8   :  { %v941_v46 = vor.u32 1.1754944e-38, %v940_v3  ;;  %vm939_vm6 = vcmp.eq.f32.partialorder %v938_v31, 8.507059e+37 }
0x19bc   :  { %v1469_v41 = vpop.eup %1468 }
0x19bd   :  { %v930_v42 = vmul.f32 %v1469_v41, %v928_v40  ;;  %vm935_vm2 = vweird.f32 %v1469_v41 }
0x19be   :  { %vm936_vm4 = vmor %vm934_vm3, %vm935_vm2 }
0x19bf   :  { %v931_v43 = vsub.f32 1.0, %v930_v42 }
0x19c1   :  { %v932_v1 = vmul.f32 %v1469_v41, %v931_v43 }
0x19c3   :  { %v933_v44 = vadd.f32 %v1469_v41, %v932_v1 }
0x19c5   :  { %v937_v45 = vsel %vm936_vm4, %v1469_v41, %v933_v44 }
0x19c6   :  { %v942_v48 = vsel %vm939_vm6, %v941_v46, %v937_v45 }
0x19c7   :  { %v945_v50 = vmul.f32 %v942_v48, %v891_v23 }
0x1a0c   :  { %v948_v47 = vpop.permute.xlu2 %947 }
0x1a0d   :  { %v950_v49 = vmul.f32 %v948_v47, %v942_v48 }
0x1a0f   :  { %952 = vrot.lane.b32.xlu0 %v950_v49, %s1498_s4 }
0x1a81   :  { %v953_v51 = vpop.permute.xlu0 %952 }
0x1a82   :  { %v955_v52 = vadd.f32 %v953_v51, %v945_v50 }
0x1a84   :  { %1470 = vtanh.f32 %v955_v52 }
0x1a8a   :  { %v1471_v53 = vpop.eup %1470 }
0x1a8b   :  { %958 = vrot.lane.b32.xlu1 %v1471_v53, %s1497_s21 }
0x1afd   :  { %v959_v54 = vpop.permute.xlu1 %958 }
0x1afe   :  { %v1730_v56 = vmul.f32 %v959_v54, %v942_v48 }
0x1b00   :  { %v968_v57 = vpack.c.bf16 %v1730_v56, %v1730_v56 }
0x1b02   :  { %970 = vrot.lane.b32.xlu2 %v968_v57, %s1498_s4  ;;  %v200_v57 = vadd.f32 %v1672_v55, %v1703_v34 }
0x1b5c   :  { %v971_v58 = vpop.permute.xlu2 %970 }
0x1b5d   :  { %1326 = vmatmul.msk.bf16.vlgmr.msra.gmra.mxu0 %vm231_vm5, %v971_v58 }
0x1bda   :  { %v984_v61 = vpop.f32.mrf.mxu0 }
0x1bdb   :  { %v988_v62 = vadd.f32 %v984_v61, %v195_v60 }
0x1bdd   :  { %1472 = vtanh.f32 %v988_v62  ;;  %v1327_v2 = vmul.f32 -1.442695, %v988_v62 }
0x1bdf   :  { %1474 = vpow2.f32 %v1327_v2 }
0x1be2   :  { %v986_v63 = vpop.f32.mrf.mxu0 }
0x1be3   :  { %v1473_v0 = vpop.eup %1472 }
0x1be4   :  { %1011 = vrot.lane.b32.xlu0 %v1473_v0, %s1497_s21 }
0x1be5   :  { %v1475_v4 = vpop.eup %1474 }
0x1be6   :  { %v992_v6 = vadd.f32 1.0, %v1475_v4 }
0x1be8   :  { %1476 = vrcp.f32 %v992_v6  ;;  %v1004_v12 = vand.u32 2147483648, %v992_v6  ;;  %vm998_vm8 = vweird.f32 %v992_v6  ;;  %v1002_v32 = vand.u32 2147483647, %v992_v6 }
0x1bea   :  { %v1005_v14 = vor.u32 1.1754944e-38, %v1004_v12  ;;  %vm1003_vm0 = vcmp.eq.f32.partialorder %v1002_v32, 8.507059e+37 }
0x1bee   :  { %v1477_v7 = vpop.eup %1476 }
0x1bef   :  { %v994_v8 = vmul.f32 %v1477_v7, %v992_v6  ;;  %vm999_vm7 = vweird.f32 %v1477_v7 }
0x1bf0   :  { %vm1000_vm9 = vmor %vm998_vm8, %vm999_vm7 }
0x1bf1   :  { %v995_v9 = vsub.f32 1.0, %v994_v8 }
0x1bf3   :  { %v996_v10 = vmul.f32 %v1477_v7, %v995_v9 }
0x1bf5   :  { %v997_v11 = vadd.f32 %v1477_v7, %v996_v10 }
0x1bf7   :  { %v1001_v13 = vsel %vm1000_vm9, %v1477_v7, %v997_v11 }
0x1bf8   :  { %v1006_v16 = vsel %vm1003_vm0, %v1005_v14, %v1001_v13 }
0x1bf9   :  { %v1009_v18 = vmul.f32 %v1006_v16, %v955_v52 }
0x1c56   :  { %v1012_v15 = vpop.permute.xlu0 %1011 }
0x1c57   :  { %v1014_v17 = vmul.f32 %v1012_v15, %v1006_v16  ;;  %v1365_v15 = vld [vmem:[%s1818_s8 + $0x8] sm:$0xff] }
0x1c58   :  { %1367 = vmatpush.bf16.msrb.mxu3 %v1365_v15  ;;  %1208 = vmatpush.bf16.msrb.mxu0 %v1365_v15 }
0x1c59   :  { %1016 = vrot.lane.b32.xlu1 %v1014_v17, %s1498_s4 }
0x1ccb   :  { %v1017_v19 = vpop.permute.xlu1 %1016 }
0x1ccc   :  { %v1019_v20 = vadd.f32 %v1017_v19, %v1009_v18 }
0x1cce   :  { %1478 = vtanh.f32 %v1019_v20 }
0x1cd4   :  { %v1479_v21 = vpop.eup %1478 }
0x1cd5   :  { %1022 = vrot.lane.b32.xlu2 %v1479_v21, %s1497_s21 }
0x1d2f   :  { %v1023_v22 = vpop.permute.xlu2 %1022 }
0x1d30   :  { %v1025_v23 = vmul.f32 %v1023_v22, %v1006_v16  ;;  %v1364_v16 = vld [vmem:[%s1818_s8] sm:$0xff] }
0x1d31   :  { %1368 = vmatpush.bf16.msrb.mxu3 %v1364_v16  ;;  %1209 = vmatpush.bf16.msrb.mxu0 %v1364_v16 }
0x1d32   :  { %v1032_v24 = vpack.c.bf16 %v1025_v23, %v1025_v23 }
0x1d34   :  { %1034 = vrot.lane.b32.xlu0 %v1032_v24, %s1498_s4 }
0x1da6   :  { %v1035_v26 = vpop.permute.xlu0 %1034 }
0x1da7   :  { %1328 = vmatmul.msk.bf16.vlgmr.msrb.gmra.mxu1 %vm231_vm5, %v1035_v26  ;;  %v1499_v26 = vmov 0.0  }
0x1da8   :  { %1230 = vst [vmem:[%s1820_s10] sm:$0xff] %v1499_v26 }
0x1e24   :  { %v1048_v29 = vpop.f32.mrf.mxu1 }
0x1e25   :  { %v1052_v30 = vadd.f32 %v1048_v29, %v197_v28 }
0x1e27   :  { %1480 = vtanh.f32 %v1052_v30  ;;  %v1329_v37 = vmul.f32 -1.442695, %v1052_v30 }
0x1e29   :  { %1482 = vpow2.f32 %v1329_v37 }
0x1e2c   :  { %v1050_v35 = vpop.f32.mrf.mxu1 }
0x1e2d   :  { %v1481_v36 = vpop.eup %1480 }
0x1e2e   :  { %1075 = vrot.lane.b32.xlu1 %v1481_v36, %s1497_s21 }
0x1e2f   :  { %v1483_v38 = vpop.eup %1482 }
0x1e30   :  { %v1056_v39 = vadd.f32 1.0, %v1483_v38 }
0x1e32   :  { %1484 = vrcp.f32 %v1056_v39  ;;  %v1068_v1 = vand.u32 2147483648, %v1056_v39  ;;  %vm1062_vm11 = vweird.f32 %v1056_v39  ;;  %v1066_v33 = vand.u32 2147483647, %v1056_v39 }
0x1e34   :  { %v1069_v3 = vor.u32 1.1754944e-38, %v1068_v1  ;;  %vm1067_vm13 = vcmp.eq.f32.partialorder %v1066_v33, 8.507059e+37 }
0x1e38   :  { %v1485_v5 = vpop.eup %1484 }
0x1e39   :  { %v1058_v40 = vmul.f32 %v1485_v5, %v1056_v39  ;;  %vm1063_vm10 = vweird.f32 %v1485_v5 }
0x1e3a   :  { %vm1064_vm12 = vmor %vm1062_vm11, %vm1063_vm10 }
0x1e3b   :  { %v1059_v41 = vsub.f32 1.0, %v1058_v40 }
0x1e3d   :  { %v1060_v42 = vmul.f32 %v1485_v5, %v1059_v41 }
0x1e3f   :  { %v1061_v43 = vadd.f32 %v1485_v5, %v1060_v42 }
0x1e41   :  { %v1065_v44 = vsel %vm1064_vm12, %v1485_v5, %v1061_v43 }
0x1e42   :  { %v1070_v45 = vsel %vm1067_vm13, %v1069_v3, %v1065_v44 }
0x1e43   :  { %v1073_v47 = vmul.f32 %v1070_v45, %v1019_v20 }
0x1ea0   :  { %v1076_v31 = vpop.permute.xlu1 %1075 }
0x1ea1   :  { %v1078_v46 = vmul.f32 %v1076_v31, %v1070_v45 }
0x1ea3   :  { %1080 = vrot.lane.b32.xlu2 %v1078_v46, %s1498_s4 }
0x1efd   :  { %v1081_v48 = vpop.permute.xlu2 %1080 }
0x1efe   :  { %v1083_v49 = vadd.f32 %v1081_v48, %v1073_v47 }
0x1f00   :  { %1486 = vtanh.f32 %v1083_v49 }
0x1f06   :  { %v1487_v50 = vpop.eup %1486 }
0x1f07   :  { %1086 = vrot.lane.b32.xlu0 %v1487_v50, %s1497_s21 }
0x1f79   :  { %v1087_v51 = vpop.permute.xlu0 %1086 }
0x1f7a   :  { %v1089_v52 = vmul.f32 %v1087_v51, %v1070_v45 }
0x1f7c   :  { %v1096_v53 = vpack.c.bf16 %v1089_v52, %v1089_v52 }
0x1f7e   :  { %1098 = vrot.lane.b32.xlu1 %v1096_v53, %s1498_s4 }
0x1ff0   :  { %v1099_v54 = vpop.permute.xlu1 %1098 }
0x1ff1   :  { %1330 = vmatmul.msk.bf16.vlgmr.msrb.gmra.mxu2 %vm231_vm5, %v1099_v54 }
0x2074   :  { %v1112_v58 = vpop.f32.mrf.mxu2 }
0x2075   :  { %v1116_v60 = vadd.f32 %v1112_v58, %v200_v57 }
0x2077   :  { %1488 = vtanh.f32 %v1116_v60  ;;  %v1331_v63 = vmul.f32 -1.442695, %v1116_v60 }
0x2079   :  { %1490 = vpow2.f32 %v1331_v63 }
0x207c   :  { %v1114_v61 = vpop.f32.mrf.mxu2 }
0x207d   :  { %v1489_v62 = vpop.eup %1488 }
0x207e   :  { %1139 = vrot.lane.b32.xlu2 %v1489_v62, %s1497_s21 }
0x207f   :  { %v1491_v0 = vpop.eup %1490 }
0x2080   :  { %v1120_v2 = vadd.f32 1.0, %v1491_v0 }
0x2082   :  { %1492 = vrcp.f32 %v1120_v2  ;;  %v1132_v8 = vand.u32 2147483648, %v1120_v2  ;;  %vm1126_vm15 = vweird.f32 %v1120_v2  ;;  %v1130_v9 = vand.u32 2147483647, %v1120_v2 }
0x2084   :  { %vm1131_vm2 = vcmp.eq.f32.partialorder %v1130_v9, 8.507059e+37 }
0x2086   :  { %1027 = vrot.lane.b32.xlu2 %v1025_v23, %s1498_s4 }
0x2088   :  { %v1493_v55 = vpop.eup %1492 }
0x2089   :  { %v1122_v34 = vmul.f32 %v1493_v55, %v1120_v2  ;;  %vm1127_vm14 = vweird.f32 %v1493_v55 }
0x208a   :  { %vm1128_vm1 = vmor %vm1126_vm15, %vm1127_vm14 }
0x208b   :  { %v1123_v4 = vsub.f32 1.0, %v1122_v34 }
0x208d   :  { %v1124_v6 = vmul.f32 %v1493_v55, %v1123_v4 }
0x208e   :  { %835 = vrot.lane.b32.xlu2 %v1709_v59, %s1498_s4  ;;  %v1133_v59 = vor.u32 1.1754944e-38, %v1132_v8 }
0x208f   :  { %v1125_v7 = vadd.f32 %v1493_v55, %v1124_v6 }
0x2091   :  { %v1129_v10 = vsel %vm1128_vm1, %v1493_v55, %v1125_v7 }
0x2096   :  { %963 = vrot.lane.b32.xlu2 %v1730_v56, %s1498_s4  ;;  %v1134_v56 = vsel %vm1131_vm2, %v1133_v59, %v1129_v10 }
0x2097   :  { %v1137_v17 = vmul.f32 %v1134_v56, %v1083_v49 }
0x20d8   :  { %v1140_v11 = vpop.permute.xlu2 %1139 }
0x20d9   :  { %v1142_v12 = vmul.f32 %v1140_v11, %v1134_v56 }
0x20db   :  { %1144 = vrot.lane.b32.xlu0 %v1142_v12, %s1498_s4 }
0x20e0   :  { %v1028_v32 = vpop.permute.xlu2 %1027 }
0x20e1   :  { %1030 = vst.msk [vmem:[#allocation4 + $0x20] sm:$0xff] %vm231_vm5, %v1028_v32 }
0x20e3   :  { %1091 = vrot.lane.b32.xlu0 %v1089_v52, %s1498_s4 }
0x20e8   :  { %v836_v13 = vpop.permute.xlu2 %835  ;;  %v1163_v22 = vld [vmem:[#allocation4 + $0x20] sm:$0xff] }
0x20e9   :  { %838 = vst.msk [vmem:[#allocation4 + $0x8] sm:$0xff] %vm231_vm5, %v836_v13 }
0x20f0   :  { %v964_v14 = vpop.permute.xlu2 %963 }
0x20f1   :  { %966 = vst.msk [vmem:[#allocation4 + $0x18] sm:$0xff] %vm231_vm5, %v964_v14 }
0x20f8   :  { %v1162_v40 = vld [vmem:[#allocation4 + $0x18] sm:$0xff] }
0x214d   :  { %v1145_v18 = vpop.permute.xlu0 %1144 }
0x214e   :  { %v1147_v19 = vadd.f32 %v1145_v18, %v1137_v17 }
0x2150   :  { %1494 = vtanh.f32 %v1147_v19 }
0x2155   :  { %v1092_v20 = vpop.permute.xlu0 %1091 }
0x2156   :  { %v1495_v21 = vpop.eup %1494  ;;  %1094 = vst.msk [vmem:[#allocation4 + $0x28] sm:$0xff] %vm231_vm5, %v1092_v20 }
0x2157   :  { %1150 = vrot.lane.b32.xlu1 %v1495_v21, %s1497_s21 }
0x215d   :  { %v1164_v23 = vld [vmem:[#allocation4 + $0x28] sm:$0xff] }
0x215e   :  { %v1168_v24 = vpack.c.bf16 %v1164_v23, %v1163_v22 }
0x215f   :  { %771 = vrot.lane.b32.xlu1 %v1690_v25, %s1498_s4  ;;  %v1160_v25 = vld [vmem:[#allocation4 + $0x8] sm:$0xff] }
0x2160   :  { %1342 = vmatmul.msk.bf16.vlgmr.msrb.gmra.mxu3 %vm231_vm5, %v1168_v24 }
0x2167   :  { %899 = vrot.lane.b32.xlu1 %v1719_v27, %s1498_s4  ;;  %v1375_v27 = vld [vmem:[%s1819_s9] ss:$0 sm:$0xff] }
0x21c9   :  { %v1151_v28 = vpop.permute.xlu1 %1150 }
0x21ca   :  { %v1153_v29 = vmul.f32 %v1151_v28, %v1134_v56 }
0x21cc   :  { %1155 = vrot.lane.b32.xlu0 %v1153_v29, %s1498_s4 }
0x21d1   :  { %v772_v30 = vpop.permute.xlu1 %771 }
0x21d2   :  { %774 = vst.msk [vmem:[#allocation4] sm:$0xff] %vm231_vm5, %v772_v30 }
0x21d9   :  { %v900_v35 = vpop.permute.xlu1 %899  ;;  %v1159_v36 = vld [vmem:[#allocation4] sm:$0xff] }
0x21da   :  { %902 = vst.msk [vmem:[#allocation4 + $0x10] sm:$0xff] %vm231_vm5, %v900_v35  ;;  %v1166_v37 = vpack.c.bf16 %v1160_v25, %v1159_v36 }
0x21dc   :  { %1340 = vmatmul.msk.bf16.vlgmr.msrb.gmra.mxu0 %vm231_vm5, %v1166_v37 }
0x21e1   :  { %v1161_v5 = vld [vmem:[#allocation4 + $0x10] sm:$0xff] }
0x21e2   :  { %v1167_v41 = vpack.c.bf16 %v1162_v40, %v1161_v5 }
0x21e3   :  { %v1221_v38 = vpop.f32.mrf.mxu3 }
0x21e4   :  { %v1222_v39 = vadd.f32 %v1375_v27, %v1221_v38 }
0x21e6   :  { %1348 = vst [vmem:[%s1820_s10 + $0x28] sm:$0xff] %v1222_v39 }
0x21eb   :  { %v1223_v42 = vpop.f32.mrf.mxu3 }
0x21ec   :  { %v1224_v43 = vadd.f32 %v1375_v27, %v1223_v42  ;;  %1341 = vmatmul.msk.bf16.gmra.mxu0 %vm231_vm5, %v1167_v41 }
0x21ee   :  { %1349 = vst [vmem:[%s1820_s10 + $0x30] sm:$0xff] %v1224_v43 }
0x223e   :  { %v1156_v1 = vpop.permute.xlu0 %1155 }
0x223f   :  { %1158 = vst.msk [vmem:[#allocation4 + $0x30] sm:$0xff] %vm231_vm5, %v1156_v1 }
0x2246   :  { %v1165_v33 = vld [vmem:[#allocation4 + $0x30] sm:$0xff] }
0x2247   :  { %v1169_v44 = vpack.c.bf16 %v1165_v33, %v1165_v33 }
0x2249   :  { %1343 = vmatmul.msk.bf16.gmra.mxu3 %vm231_vm5, %v1169_v44 }
0x2259   :  { %v1211_v3 = vpop.f32.mrf.mxu0 }
0x225a   :  { %v1212_v31 = vadd.f32 %v1375_v27, %v1211_v3 }
0x225c   :  { %1344 = vst [vmem:[%s1820_s10 + $0x8] sm:$0xff] %v1212_v31 }
0x2261   :  { %v1213_v45 = vpop.f32.mrf.mxu0 }
0x2262   :  { %v1214_v46 = vadd.f32 %v1375_v27, %v1213_v45 }
0x2264   :  { %1345 = vst [vmem:[%s1820_s10 + $0x10] sm:$0xff] %v1214_v46 }
0x2269   :  { %v1216_v47 = vpop.f32.mrf.mxu0 }
0x226a   :  { %v1217_v48 = vadd.f32 %v1375_v27, %v1216_v47 }
0x226c   :  { %1346 = vst [vmem:[%s1820_s10 + $0x18] sm:$0xff] %v1217_v48 }
0x2271   :  { %v1218_v49 = vpop.f32.mrf.mxu0 }
0x2272   :  { %v1219_v50 = vadd.f32 %v1375_v27, %v1218_v49 }
0x2274   :  { %1347 = vst [vmem:[%s1820_s10 + $0x20] sm:$0xff] %v1219_v50 }
0x22cc   :  { %v1226_v51 = vpop.f32.mrf.mxu3 }
0x22cd   :  { %v1227_v52 = vadd.f32 %v1375_v27, %v1226_v51 }
0x22cf   :  { %1350 = vst [vmem:[%s1820_s10 + $0x38] sm:$0xff] %v1227_v52 }
0x22d4   :  { %v1228_v53 = vpop.f32.mrf.mxu3 }

</bundles_post_ra>
